<compile_context>
chip_gen: v7x
topology: tpu7x:2x2x1
jax: 0.10.0
libtpu: 0.0.40
codegen_flags: <defaults>
</compile_context>

<pallas_src>
import functools

import jax
import jax.numpy as jnp
from jax.experimental import pallas as pl
from jax.experimental.pallas import tpu as pltpu


VMEM_LIMIT = 48 * 1024 * 1024  # fits v7x (64 MiB phys) and raises v5e/v6e default


def _tile(dim, cap, align):
    """Largest tile <= cap that divides dim (multiple of align), else full dim."""
    if dim <= cap:
        return dim
    t = (cap // align) * align
    while t >= align:
        if dim % t == 0:
            return t
        t -= align
    return dim


# ----------------------------------------------------------------------------
# Pallas kernels
# ----------------------------------------------------------------------------

def _mm_kernel(x_ref, w_ref, bias_ref, *rest, activation, trans_w, has_res):
    """Tiled matmul with K-axis accumulation, fused bias/activation/residual."""
    if has_res:
        res_ref, o_ref, acc_ref = rest
    else:
        o_ref, acc_ref = rest
        res_ref = None

    kdim = pl.program_id(2)

    @pl.when(kdim == 0)
    def _init():
        acc_ref[...] = jnp.zeros_like(acc_ref)

    x = x_ref[...].astype(jnp.bfloat16)
    w = w_ref[...]
    if trans_w:
        acc_ref[...] += jax.lax.dot_general(
            x, w, (((1,), (1,)), ((), ())), preferred_element_type=jnp.float32)
    else:
        acc_ref[...] += jnp.dot(x, w, preferred_element_type=jnp.float32)

    @pl.when(kdim == pl.num_programs(2) - 1)
    def _flush():
        out = acc_ref[...] + bias_ref[...]
        if activation == "relu":
            out = jnp.maximum(out, 0.0)
        if has_res:
            out = out + res_ref[...]
        o_ref[...] = out.astype(o_ref.dtype)


def matmul(x, w, b=None, residual=None, activation=None, trans_w=False,
           tm_cap=256, tn_cap=512, tk_cap=512):
    """x: (M, K) f32, w: (K, N) (or (N, K) if trans_w) bf16 -> (M, N) f32."""
    x = x.astype(jnp.float32)
    w = w.astype(jnp.bfloat16)
    M, K = x.shape
    if trans_w:
        N = w.shape[0]
        assert w.shape[1] == K
    else:
        N = w.shape[1]
        assert w.shape[0] == K
    if b is None:
        b = jnp.zeros((N,), jnp.float32)
    b2 = b.reshape(1, N).astype(jnp.float32)

    tm = _tile(M, tm_cap, 8)
    tn = _tile(N, tn_cap, 128)
    tk = _tile(K, tk_cap, 128)
    grid = (M // tm, N // tn, K // tk)

    in_specs = [
        pl.BlockSpec((tm, tk), lambda i, j, k: (i, k)),
        (pl.BlockSpec((tn, tk), lambda i, j, k: (j, k)) if trans_w
         else pl.BlockSpec((tk, tn), lambda i, j, k: (k, j))),
        pl.BlockSpec((1, tn), lambda i, j, k: (0, j)),
    ]
    args = [x, w, b2]
    has_res = residual is not None
    if has_res:
        in_specs.append(pl.BlockSpec((tm, tn), lambda i, j, k: (i, j)))
        args.append(residual.astype(jnp.float32))

    kern = functools.partial(_mm_kernel, activation=activation,
                             trans_w=trans_w, has_res=has_res)
    return pl.pallas_call(
        kern,
        out_shape=jax.ShapeDtypeStruct((M, N), jnp.float32),
        grid=grid,
        in_specs=in_specs,
        out_specs=pl.BlockSpec((tm, tn), lambda i, j, k: (i, j)),
        scratch_shapes=[pltpu.VMEM((tm, tn), jnp.float32)],
        compiler_params=pltpu.CompilerParams(
            dimension_semantics=("parallel", "parallel", "arbitrary"),
            vmem_limit_bytes=VMEM_LIMIT),
    )(*args)


def _ln_mm_kernel(x_ref, g_ref, b_ref, w_ref, bias_ref, o_ref, *,
                  activation, trans_w, eps):
    """LayerNorm the (tm, D) tile in VMEM, then matmul against a (D, tn) tile."""
    x = x_ref[...].astype(jnp.float32)
    mean = jnp.mean(x, axis=-1, keepdims=True)
    var = jnp.mean(jnp.square(x - mean), axis=-1, keepdims=True)
    inv = jax.lax.rsqrt(var + eps)
    xn = ((x - mean) * inv * g_ref[...] + b_ref[...]).astype(jnp.bfloat16)
    w = w_ref[...]
    if trans_w:
        acc = jax.lax.dot_general(
            xn, w, (((1,), (1,)), ((), ())), preferred_element_type=jnp.float32)
    else:
        acc = jnp.dot(xn, w, preferred_element_type=jnp.float32)
    acc = acc + bias_ref[...]
    if activation == "relu":
        acc = jnp.maximum(acc, 0.0)
    o_ref[...] = acc.astype(o_ref.dtype)


def ln_matmul(x, gamma, beta, w, b=None, activation=None, trans_w=False,
              eps=1e-5, tm_cap=256, tn_cap=512):
    """Fused LayerNorm(x) @ w (+ bias, activation). LN axis (=K) stays untiled."""
    x = x.astype(jnp.float32)
    w = w.astype(jnp.bfloat16)
    M, D = x.shape
    if trans_w:
        N = w.shape[0]
        assert w.shape[1] == D
    else:
        N = w.shape[1]
        assert w.shape[0] == D
    if b is None:
        b = jnp.zeros((N,), jnp.float32)
    b2 = b.reshape(1, N).astype(jnp.float32)
    g2 = gamma.reshape(1, D).astype(jnp.float32)
    be2 = beta.reshape(1, D).astype(jnp.float32)

    tm = _tile(M, tm_cap, 8)
    tn = _tile(N, tn_cap, 128)
    grid = (M // tm, N // tn)

    w_spec = (pl.BlockSpec((tn, D), lambda i, j: (j, 0)) if trans_w
              else pl.BlockSpec((D, tn), lambda i, j: (0, j)))
    kern = functools.partial(_ln_mm_kernel, activation=activation,
                             trans_w=trans_w, eps=eps)
    return pl.pallas_call(
        kern,
        out_shape=jax.ShapeDtypeStruct((M, N), jnp.float32),
        grid=grid,
        in_specs=[
            pl.BlockSpec((tm, D), lambda i, j: (i, 0)),
            pl.BlockSpec((1, D), lambda i, j: (0, 0)),
            pl.BlockSpec((1, D), lambda i, j: (0, 0)),
            w_spec,
            pl.BlockSpec((1, tn), lambda i, j: (0, j)),
        ],
        out_specs=pl.BlockSpec((tm, tn), lambda i, j: (i, j)),
        compiler_params=pltpu.CompilerParams(
            dimension_semantics=("parallel", "parallel"),
            vmem_limit_bytes=VMEM_LIMIT),
    )(x, g2, be2, w, b2)


def _ln_kernel(x_ref, g_ref, b_ref, o_ref, *, eps):
    x = x_ref[...].astype(jnp.float32)
    mean = jnp.mean(x, axis=-1, keepdims=True)
    var = jnp.mean(jnp.square(x - mean), axis=-1, keepdims=True)
    inv = jax.lax.rsqrt(var + eps)
    o_ref[...] = ((x - mean) * inv * g_ref[...] + b_ref[...]).astype(o_ref.dtype)


def layer_norm(x, gamma, beta, eps=1e-5, tm_cap=512):
    """Standalone LayerNorm over the last dim; tiled over rows."""
    M, D = x.shape
    tm = _tile(M, tm_cap, 8)
    g2 = gamma.reshape(1, D).astype(jnp.float32)
    b2 = beta.reshape(1, D).astype(jnp.float32)
    return pl.pallas_call(
        functools.partial(_ln_kernel, eps=eps),
        out_shape=jax.ShapeDtypeStruct((M, D), jnp.float32),
        grid=(M // tm,),
        in_specs=[
            pl.BlockSpec((tm, D), lambda i: (i, 0)),
            pl.BlockSpec((1, D), lambda i: (0, 0)),
            pl.BlockSpec((1, D), lambda i: (0, 0)),
        ],
        out_specs=pl.BlockSpec((tm, D), lambda i: (i, 0)),
        compiler_params=pltpu.CompilerParams(
            dimension_semantics=("parallel",),
            vmem_limit_bytes=VMEM_LIMIT),
    )(x.astype(jnp.float32), g2, b2)


def _attn_kernel(q_ref, k_ref, v_ref, o_ref, *, nhead, scale, causal):
    """Per-batch attention on head-packed (S, D=H*Dh) tiles (lane-dense I/O)."""
    q = q_ref[0]                       # (Sq, D) f32
    k = k_ref[0]                       # (Sk, D) f32
    v = v_ref[0]                       # (Sk, D) f32
    Sq, D = q.shape
    Sk = k.shape[0]
    Dh = D // nhead

    if causal:
        row = jax.lax.broadcasted_iota(jnp.int32, (Sq, Sk), 0)
        col = jax.lax.broadcasted_iota(jnp.int32, (Sq, Sk), 1)
        neg = jnp.where(col <= row, jnp.float32(0.0), jnp.float32(-1e30))

    ctxs = []
    for h in range(nhead):                       # static unrolled head loop
        sl = slice(h * Dh, (h + 1) * Dh)
        qh = q[:, sl].astype(jnp.bfloat16)
        kh = k[:, sl].astype(jnp.bfloat16)
        vh = v[:, sl].astype(jnp.bfloat16)
        s = jax.lax.dot_general(
            qh, kh, (((1,), (1,)), ((), ())),
            preferred_element_type=jnp.float32) * scale      # (Sq, Sk) f32
        if causal:
            s = s + neg
        m = jnp.max(s, axis=-1, keepdims=True)
        p = jnp.exp(s - m)
        denom = jnp.sum(p, axis=-1, keepdims=True)
        p = p * pl.reciprocal(denom, approx=True)
        ctx = jnp.dot(p.astype(jnp.bfloat16), vh,
                      preferred_element_type=jnp.float32)    # (Sq, Dh)
        ctxs.append(ctx)
    o_ref[0] = jnp.concatenate(ctxs, axis=-1).astype(o_ref.dtype)


def attention(q, k, v, *, nhead, causal):
    """q: (B, Sq, D), k/v: (B, Sk, D) head-packed -> (B, Sq, D)."""
    B, Sq, D = q.shape
    Sk = k.shape[1]
    scale = 1.0 / ((D // nhead) ** 0.5)
    kern = functools.partial(_attn_kernel, nhead=nhead, scale=scale, causal=causal)
    return pl.pallas_call(
        kern,
        out_shape=jax.ShapeDtypeStruct((B, Sq, D), jnp.float32),
        grid=(B,),
        in_specs=[
            pl.BlockSpec((1, Sq, D), lambda b: (b, 0, 0)),
            pl.BlockSpec((1, Sk, D), lambda b: (b, 0, 0)),
            pl.BlockSpec((1, Sk, D), lambda b: (b, 0, 0)),
        ],
        out_specs=pl.BlockSpec((1, Sq, D), lambda b: (b, 0, 0)),
        compiler_params=pltpu.CompilerParams(
            dimension_semantics=("parallel",),
            vmem_limit_bytes=VMEM_LIMIT),
    )(q.astype(jnp.float32), k.astype(jnp.float32), v.astype(jnp.float32))


# ----------------------------------------------------------------------------
# Transformer blocks built from the Pallas kernels (glue in plain JAX)
# ----------------------------------------------------------------------------

def self_attention_block(x, ln_g, ln_b, p, nhead, causal):
    """pre-LN -> fused QKV -> attention -> output proj (+residual fused)."""
    B, S, D = x.shape
    x2 = x.reshape(B * S, D)
    qkv = ln_matmul(x2, ln_g, ln_b, p["wqkv"], p["bqkv"])       # (B*S, 3D)
    qkv = qkv.reshape(B, S, 3 * D)
    q, k, v = qkv[..., :D], qkv[..., D:2 * D], qkv[..., 2 * D:]
    ctx = attention(q, k, v, nhead=nhead, causal=causal)        # (B, S, D)
    out = matmul(ctx.reshape(B * S, D), p["wo"], p["bo"], residual=x2)
    return out.reshape(B, S, D)


def cross_attention_block(x, enc, ln_g, ln_b, p, nhead):
    B, Sq, D = x.shape
    Sk = enc.shape[1]
    x2 = x.reshape(B * Sq, D)
    q = ln_matmul(x2, ln_g, ln_b, p["wq"], p["bq"]).reshape(B, Sq, D)
    kv = matmul(enc.reshape(B * Sk, D), p["wkv"], p["bkv"]).reshape(B, Sk, 2 * D)
    k, v = kv[..., :D], kv[..., D:]
    ctx = attention(q, k, v, nhead=nhead, causal=False)
    out = matmul(ctx.reshape(B * Sq, D), p["wo"], p["bo"], residual=x2)
    return out.reshape(B, Sq, D)


def ffn_block(x, ln_g, ln_b, p):
    """pre-LN -> W1+ReLU (fused) -> W2 (+bias+residual fused)."""
    B, S, D = x.shape
    x2 = x.reshape(B * S, D)
    h = ln_matmul(x2, ln_g, ln_b, p["w1"], p["b1"], activation="relu")
    out = matmul(h, p["w2"], p["b2"], residual=x2)
    return out.reshape(B, S, D)


def encoder_layer(x, lp, nhead):
    x = self_attention_block(x, lp["ln1_g"], lp["ln1_b"], lp["attn"],
                             nhead, causal=False)
    x = ffn_block(x, lp["ln2_g"], lp["ln2_b"], lp["ffn"])
    return x


def decoder_layer(x, enc, lp, nhead):
    x = self_attention_block(x, lp["ln1_g"], lp["ln1_b"], lp["self_attn"],
                             nhead, causal=True)
    x = cross_attention_block(x, enc, lp["ln2_g"], lp["ln2_b"],
                              lp["cross_attn"], nhead)
    x = ffn_block(x, lp["ln3_g"], lp["ln3_b"], lp["ffn"])
    return x


def encoder_forward(inputs_embeds, params, nhead):
    """LSTransformerEncoder.forward: (B, S, D) -> last_hidden_state (S, B, D)."""
    x = inputs_embeds.astype(jnp.float32)
    for lp in params["layers"]:
        x = encoder_layer(x, lp, nhead)
    B, S, D = x.shape
    x = layer_norm(x.reshape(B * S, D), params["ln_g"], params["ln_b"])
    x = x.reshape(B, S, D)
    return jnp.transpose(x, (1, 0, 2))          # x.transpose(0, 1)


def decoder_forward(inputs_embeds, encoder_hidden_states, params, nhead):
    """LSTransformerDecoder.forward: (B, St, D), enc (S, B, D) -> (B, St, V)."""
    x = inputs_embeds.astype(jnp.float32)
    enc = jnp.transpose(encoder_hidden_states, (1, 0, 2))   # back to (B, Ss, D)
    for lp in params["layers"]:
        x = decoder_layer(x, enc, lp, nhead)
    B, St, D = x.shape
    V = params["embed"].shape[0]
    # Fused final-LayerNorm + tied output projection against embed (V, D)
    # (contract on the second axis of embed; no transposed copy is materialized).
    logits = ln_matmul(x.reshape(B * St, D), params["ln_g"], params["ln_b"],
                       params["embed"], None, trans_w=True)
    return logits.reshape(B, St, V)


# ----------------------------------------------------------------------------
# Deterministic parameter init (matmul weights stored in bf16 for the MXU)
# ----------------------------------------------------------------------------

def _bf16(x):
    return x.astype(jnp.bfloat16)


def _init_self_attn(key, D):
    k1, k2 = jax.random.split(key)
    return dict(
        wqkv=_bf16(0.02 * jax.random.normal(k1, (D, 3 * D), jnp.float32)),
        bqkv=jnp.zeros((3 * D,), jnp.float32),
        wo=_bf16(0.02 * jax.random.normal(k2, (D, D), jnp.float32)),
        bo=jnp.zeros((D,), jnp.float32))


def _init_cross_attn(key, D):
    k1, k2, k3 = jax.random.split(key, 3)
    return dict(
        wq=_bf16(0.02 * jax.random.normal(k1, (D, D), jnp.float32)),
        bq=jnp.zeros((D,), jnp.float32),
        wkv=_bf16(0.02 * jax.random.normal(k2, (D, 2 * D), jnp.float32)),
        bkv=jnp.zeros((2 * D,), jnp.float32),
        wo=_bf16(0.02 * jax.random.normal(k3, (D, D), jnp.float32)),
        bo=jnp.zeros((D,), jnp.float32))


def _init_ffn(key, D, I):
    k1, k2 = jax.random.split(key)
    return dict(
        w1=_bf16(0.02 * jax.random.normal(k1, (D, I), jnp.float32)),
        b1=jnp.zeros((I,), jnp.float32),
        w2=_bf16(0.02 * jax.random.normal(k2, (I, D), jnp.float32)),
        b2=jnp.zeros((D,), jnp.float32))


def init_params(key, *, num_enc, num_dec, D, I, V):
    keys = jax.random.split(key, num_enc + 2 * num_dec + 1)
    enc_layers, dec_layers = [], []
    idx = 0
    for _ in range(num_enc):
        k1, k2 = jax.random.split(keys[idx]); idx += 1
        enc_layers.append(dict(
            ln1_g=jnp.ones((D,), jnp.float32), ln1_b=jnp.zeros((D,), jnp.float32),
            ln2_g=jnp.ones((D,), jnp.float32), ln2_b=jnp.zeros((D,), jnp.float32),
            attn=_init_self_attn(k1, D), ffn=_init_ffn(k2, D, I)))
    for _ in range(num_dec):
        k1, k2 = jax.random.split(keys[idx]); idx += 1
        k3, k4 = jax.random.split(keys[idx]); idx += 1
        dec_layers.append(dict(
            ln1_g=jnp.ones((D,), jnp.float32), ln1_b=jnp.zeros((D,), jnp.float32),
            ln2_g=jnp.ones((D,), jnp.float32), ln2_b=jnp.zeros((D,), jnp.float32),
            ln3_g=jnp.ones((D,), jnp.float32), ln3_b=jnp.zeros((D,), jnp.float32),
            self_attn=_init_self_attn(k1, D),
            cross_attn=_init_cross_attn(k3, D),
            ffn=_init_ffn(k2, D, I)))
    embed = _bf16(0.02 * jax.random.normal(keys[idx], (V, D), jnp.float32))
    encoder = dict(layers=enc_layers,
                   ln_g=jnp.ones((D,), jnp.float32), ln_b=jnp.zeros((D,), jnp.float32))
    decoder = dict(layers=dec_layers,
                   ln_g=jnp.ones((D,), jnp.float32), ln_b=jnp.zeros((D,), jnp.float32),
                   embed=embed)
    return encoder, decoder


# ----------------------------------------------------------------------------
# Main
# ----------------------------------------------------------------------------

if __name__ == "__main__":
    # Small config consistent with LSTransformer.get_config
    B, S_SRC, S_TGT = 2, 8, 8
    D, I, NHEAD, V = 32, 64, 4, 128
    NUM_ENC, NUM_DEC = 2, 2

    key = jax.random.PRNGKey(0)
    k_enc_in, k_dec_in, k_params = jax.random.split(key, 3)

    enc_params, dec_params = init_params(
        k_params, num_enc=NUM_ENC, num_dec=NUM_DEC, D=D, I=I, V=V)

    src_embeds = jax.random.normal(k_enc_in, (B, S_SRC, D), jnp.float32)
    tgt_embeds = jax.random.normal(k_dec_in, (B, S_TGT, D), jnp.float32)

    enc_fn = jax.jit(functools.partial(encoder_forward, nhead=NHEAD))
    dec_fn = jax.jit(functools.partial(decoder_forward, nhead=NHEAD))

    # LSTransformer.forward raises NotImplementedError ("call encoder and
    # decoder individually"), so we do exactly that.
    enc_out = enc_fn(src_embeds, enc_params)                 # (S, B, D)
    dec_logits = dec_fn(tgt_embeds, enc_out, dec_params)     # (B, St, V)

    enc_out = jax.block_until_ready(enc_out)
    dec_logits = jax.block_until_ready(dec_logits)

    assert enc_out.shape == (S_SRC, B, D)
    assert dec_logits.shape == (B, S_TGT, V)
    assert bool(jnp.all(jnp.isfinite(enc_out)))
    assert bool(jnp.all(jnp.isfinite(dec_logits)))
    print("KERNEL_OK")
</pallas_src>

<mosaic_0001>
module attributes {stable_mosaic.version = 11 : i64} {
  func.func @_mm_kernel(%arg0: i32, %arg1: i32, %arg2: i32, %arg3: memref<16x32xf32, #tpu.memory_space<vmem>>, %arg4: memref<32x32xbf16, #tpu.memory_space<vmem>>, %arg5: memref<1x32xf32, #tpu.memory_space<vmem>>, %arg6: memref<16x32xf32, #tpu.memory_space<vmem>>, %arg7: memref<16x32xf32, #tpu.memory_space<vmem>>, %arg8: memref<16x32xf32, #tpu.memory_space<vmem>>) attributes {dimension_semantics = [#tpu.dimension_semantics<parallel>, #tpu.dimension_semantics<parallel>, #tpu.dimension_semantics<arbitrary>], iteration_bounds = array<i64: 1, 1, 1>, scalar_prefetch = 0 : i64, scratch_operands = 1 : i64, tpu.core_type = #tpu.core_type<tc>, window_params = [{transform_indices = @transform_0, window_bounds = array<i64: 16, 32>}, {transform_indices = @transform_1, window_bounds = array<i64: 32, 32>}, {transform_indices = @transform_2, window_bounds = array<i64: 1, 32>}, {transform_indices = @transform_3, window_bounds = array<i64: 16, 32>}, {transform_indices = @transform_4, window_bounds = array<i64: 16, 32>}]} {
    %c0_i32 = arith.constant 0 : i32
    %0 = arith.cmpi eq, %arg2, %c0_i32 : i32
    %1 = arith.extui %0 : i1 to i32
    %c0_i32_0 = arith.constant 0 : i32
    %2 = arith.cmpi ne, %1, %c0_i32_0 : i32
    scf.if %2 {
      %cst_10 = arith.constant 0.000000e+00 : f32
      %13 = vector.broadcast %cst_10 : f32 to vector<16x32xf32>
      %c0_11 = arith.constant 0 : index
      %c0_12 = arith.constant 0 : index
      %14 = vector.load %arg8[%c0_11, %c0_12] : memref<16x32xf32, #tpu.memory_space<vmem>>, vector<16x32xf32>
      tpu.vector_store %arg8[%c0_11, %c0_12], %13 {strides = array<i32>} : memref<16x32xf32, #tpu.memory_space<vmem>>, vector<16x32xf32>,
    } else {
    }
    %c0 = arith.constant 0 : index
    %c0_1 = arith.constant 0 : index
    %3 = vector.load %arg3[%c0, %c0_1] : memref<16x32xf32, #tpu.memory_space<vmem>>, vector<16x32xf32>
    %4 = arith.truncf %3 : vector<16x32xf32> to vector<16x32xbf16>
    %c0_2 = arith.constant 0 : index
    %c0_3 = arith.constant 0 : index
    %5 = vector.load %arg4[%c0_2, %c0_3] : memref<32x32xbf16, #tpu.memory_space<vmem>>, vector<32x32xbf16>
    %c0_4 = arith.constant 0 : index
    %c0_5 = arith.constant 0 : index
    %6 = vector.load %arg8[%c0_4, %c0_5] : memref<16x32xf32, #tpu.memory_space<vmem>>, vector<16x32xf32>
    %cst = arith.constant dense<0.000000e+00> : vector<16x32xf32>
    %7 = tpu.matmul %4, %5, %cst {dimension_numbers = #tpu.dot_dimension_numbers<[1], [0], [0], [1], [0, 0, 1, 1], [], []>} : vector<16x32xbf16>, vector<32x32xbf16>, vector<16x32xf32> -> vector<16x32xf32>
    %8 = arith.addf %6, %7 : vector<16x32xf32>
    %c0_6 = arith.constant 0 : index
    %c0_7 = arith.constant 0 : index
    %9 = vector.load %arg8[%c0_6, %c0_7] : memref<16x32xf32, #tpu.memory_space<vmem>>, vector<16x32xf32>
    tpu.vector_store %arg8[%c0_6, %c0_7], %8 {strides = array<i32>} : memref<16x32xf32, #tpu.memory_space<vmem>>, vector<16x32xf32>,
    %c0_i32_8 = arith.constant 0 : i32
    %10 = arith.cmpi eq, %arg2, %c0_i32_8 : i32
    %11 = arith.extui %10 : i1 to i32
    %c0_i32_9 = arith.constant 0 : i32
    %12 = arith.cmpi ne, %11, %c0_i32_9 : i32
    scf.if %12 {
      %c0_10 = arith.constant 0 : index
      %c0_11 = arith.constant 0 : index
      %13 = vector.load %arg8[%c0_10, %c0_11] : memref<16x32xf32, #tpu.memory_space<vmem>>, vector<16x32xf32>
      %c0_12 = arith.constant 0 : index
      %c0_13 = arith.constant 0 : index
      %14 = vector.load %arg5[%c0_12, %c0_13] : memref<1x32xf32, #tpu.memory_space<vmem>>, vector<1x32xf32>
      %15 = vector.broadcast %14 : vector<1x32xf32> to vector<16x32xf32>
      %16 = arith.addf %13, %15 : vector<16x32xf32>
      %c0_14 = arith.constant 0 : index
      %c0_15 = arith.constant 0 : index
      %17 = vector.load %arg6[%c0_14, %c0_15] : memref<16x32xf32, #tpu.memory_space<vmem>>, vector<16x32xf32>
      %18 = arith.addf %16, %17 : vector<16x32xf32>
      %c0_16 = arith.constant 0 : index
      %c0_17 = arith.constant 0 : index
      %19 = vector.load %arg7[%c0_16, %c0_17] : memref<16x32xf32, #tpu.memory_space<vmem>>, vector<16x32xf32>
      tpu.vector_store %arg7[%c0_16, %c0_17], %18 {strides = array<i32>} : memref<16x32xf32, #tpu.memory_space<vmem>>, vector<16x32xf32>,
    } else {
    }
    return
  }
  func.func @transform_0(%arg0: i32, %arg1: i32, %arg2: i32) -> (i32, i32) {
    %c0_i32 = arith.constant 0 : i32
    return %arg0, %arg2 : i32, i32
  }
  func.func @transform_1(%arg0: i32, %arg1: i32, %arg2: i32) -> (i32, i32) {
    %c0_i32 = arith.constant 0 : i32
    return %arg2, %arg1 : i32, i32
  }
  func.func @transform_2(%arg0: i32, %arg1: i32, %arg2: i32) -> (i32, i32) {
    %c0_i32 = arith.constant 0 : i32
    %c0_i32_0 = arith.constant 0 : i32
    return %c0_i32, %arg1 : i32, i32
  }
  func.func @transform_3(%arg0: i32, %arg1: i32, %arg2: i32) -> (i32, i32) {
    %c0_i32 = arith.constant 0 : i32
    return %arg0, %arg1 : i32, i32
  }
  func.func @transform_4(%arg0: i32, %arg1: i32, %arg2: i32) -> (i32, i32) {
    %c0_i32 = arith.constant 0 : i32
    return %arg0, %arg1 : i32, i32
  }
}

module attributes {stable_mosaic.version = 11 : i64} {
  func.func @_ln_mm_kernel(%arg0: i32, %arg1: i32, %arg2: memref<16x32xf32, #tpu.memory_space<vmem>>, %arg3: memref<1x32xf32, #tpu.memory_space<vmem>>, %arg4: memref<1x32xf32, #tpu.memory_space<vmem>>, %arg5: memref<32x96xbf16, #tpu.memory_space<vmem>>, %arg6: memref<1x96xf32, #tpu.memory_space<vmem>>, %arg7: memref<16x96xf32, #tpu.memory_space<vmem>>) attributes {dimension_semantics = [#tpu.dimension_semantics<parallel>, #tpu.dimension_semantics<parallel>], iteration_bounds = array<i64: 1, 1>, scalar_prefetch = 0 : i64, scratch_operands = 0 : i64, tpu.core_type = #tpu.core_type<tc>, window_params = [{transform_indices = @transform_0, window_bounds = array<i64: 16, 32>}, {pipeline_mode = #tpu.pipeline_mode<synchronous>, transform_indices = @transform_1, window_bounds = array<i64: 1, 32>}, {pipeline_mode = #tpu.pipeline_mode<synchronous>, transform_indices = @transform_2, window_bounds = array<i64: 1, 32>}, {transform_indices = @transform_3, window_bounds = array<i64: 32, 96>}, {transform_indices = @transform_4, window_bounds = array<i64: 1, 96>}, {transform_indices = @transform_5, window_bounds = array<i64: 16, 96>}]} {
    %c0 = arith.constant 0 : index
    %c0_0 = arith.constant 0 : index
    %0 = vector.load %arg2[%c0, %c0_0] : memref<16x32xf32, #tpu.memory_space<vmem>>, vector<16x32xf32>
    %cst = arith.constant dense<0.000000e+00> : vector<16xf32>
    %1 = vector.multi_reduction <add>, %0, %cst [1] : vector<16x32xf32> to vector<16xf32>
    %2 = vector.shape_cast %1 : vector<16xf32> to vector<16x1xf32>
    %cst_1 = arith.constant 3.200000e+01 : f32
    %3 = vector.broadcast %cst_1 : f32 to vector<16x1xf32>
    %4 = arith.divf %2, %3 : vector<16x1xf32>
    %5 = vector.broadcast %4 : vector<16x1xf32> to vector<16x32xf32>
    %6 = arith.subf %0, %5 : vector<16x32xf32>
    %7 = arith.mulf %6, %6 : vector<16x32xf32>
    %cst_2 = arith.constant dense<0.000000e+00> : vector<16xf32>
    %8 = vector.multi_reduction <add>, %7, %cst_2 [1] : vector<16x32xf32> to vector<16xf32>
    %9 = vector.shape_cast %8 : vector<16xf32> to vector<16x1xf32>
    %cst_3 = arith.constant 3.200000e+01 : f32
    %10 = vector.broadcast %cst_3 : f32 to vector<16x1xf32>
    %11 = arith.divf %9, %10 : vector<16x1xf32>
    %cst_4 = arith.constant 9.99999974E-6 : f32
    %12 = vector.broadcast %cst_4 : f32 to vector<16x1xf32>
    %13 = arith.addf %11, %12 : vector<16x1xf32>
    %14 = math.rsqrt %13 : vector<16x1xf32>
    %15 = vector.broadcast %4 : vector<16x1xf32> to vector<16x32xf32>
    %16 = arith.subf %0, %15 : vector<16x32xf32>
    %17 = vector.broadcast %14 : vector<16x1xf32> to vector<16x32xf32>
    %18 = arith.mulf %16, %17 : vector<16x32xf32>
    %c0_5 = arith.constant 0 : index
    %c0_6 = arith.constant 0 : index
    %19 = vector.load %arg3[%c0_5, %c0_6] : memref<1x32xf32, #tpu.memory_space<vmem>>, vector<1x32xf32>
    %20 = vector.broadcast %19 : vector<1x32xf32> to vector<16x32xf32>
    %21 = arith.mulf %18, %20 : vector<16x32xf32>
    %c0_7 = arith.constant 0 : index
    %c0_8 = arith.constant 0 : index
    %22 = vector.load %arg4[%c0_7, %c0_8] : memref<1x32xf32, #tpu.memory_space<vmem>>, vector<1x32xf32>
    %23 = vector.broadcast %22 : vector<1x32xf32> to vector<16x32xf32>
    %24 = arith.addf %21, %23 : vector<16x32xf32>
    %25 = arith.truncf %24 : vector<16x32xf32> to vector<16x32xbf16>
    %c0_9 = arith.constant 0 : index
    %c0_10 = arith.constant 0 : index
    %26 = vector.load %arg5[%c0_9, %c0_10] : memref<32x96xbf16, #tpu.memory_space<vmem>>, vector<32x96xbf16>
    %cst_11 = arith.constant dense<0.000000e+00> : vector<16x96xf32>
    %27 = tpu.matmul %25, %26, %cst_11 {dimension_numbers = #tpu.dot_dimension_numbers<[1], [0], [0], [1], [0, 0, 1, 1], [], []>} : vector<16x32xbf16>, vector<32x96xbf16>, vector<16x96xf32> -> vector<16x96xf32>
    %c0_12 = arith.constant 0 : index
    %c0_13 = arith.constant 0 : index
    %28 = vector.load %arg6[%c0_12, %c0_13] : memref<1x96xf32, #tpu.memory_space<vmem>>, vector<1x96xf32>
    %29 = vector.broadcast %28 : vector<1x96xf32> to vector<16x96xf32>
    %30 = arith.addf %27, %29 : vector<16x96xf32>
    %c0_14 = arith.constant 0 : index
    %c0_15 = arith.constant 0 : index
    %31 = vector.load %arg7[%c0_14, %c0_15] : memref<16x96xf32, #tpu.memory_space<vmem>>, vector<16x96xf32>
    tpu.vector_store %arg7[%c0_14, %c0_15], %30 {strides = array<i32>} : memref<16x96xf32, #tpu.memory_space<vmem>>, vector<16x96xf32>,
    return
  }
  func.func @transform_0(%arg0: i32, %arg1: i32) -> (i32, i32) {
    %c0_i32 = arith.constant 0 : i32
    %c0_i32_0 = arith.constant 0 : i32
    return %arg0, %c0_i32 : i32, i32
  }
  func.func @transform_1(%arg0: i32, %arg1: i32) -> (i32, i32) {
    %c0_i32 = arith.constant 0 : i32
    %c0_i32_0 = arith.constant 0 : i32
    %c0_i32_1 = arith.constant 0 : i32
    return %c0_i32, %c0_i32_0 : i32, i32
  }
  func.func @transform_2(%arg0: i32, %arg1: i32) -> (i32, i32) {
    %c0_i32 = arith.constant 0 : i32
    %c0_i32_0 = arith.constant 0 : i32
    %c0_i32_1 = arith.constant 0 : i32
    return %c0_i32, %c0_i32_0 : i32, i32
  }
  func.func @transform_3(%arg0: i32, %arg1: i32) -> (i32, i32) {
    %c0_i32 = arith.constant 0 : i32
    %c0_i32_0 = arith.constant 0 : i32
    return %c0_i32, %arg1 : i32, i32
  }
  func.func @transform_4(%arg0: i32, %arg1: i32) -> (i32, i32) {
    %c0_i32 = arith.constant 0 : i32
    %c0_i32_0 = arith.constant 0 : i32
    return %c0_i32, %arg1 : i32, i32
  }
  func.func @transform_5(%arg0: i32, %arg1: i32) -> (i32, i32) {
    %c0_i32 = arith.constant 0 : i32
    return %arg0, %arg1 : i32, i32
  }
}

module attributes {stable_mosaic.version = 11 : i64} {
  func.func @_attn_kernel(%arg0: i32, %arg1: memref<1x8x32xf32, #tpu.memory_space<vmem>>, %arg2: memref<1x8x32xf32, #tpu.memory_space<vmem>>, %arg3: memref<1x8x32xf32, #tpu.memory_space<vmem>>, %arg4: memref<1x8x32xf32, #tpu.memory_space<vmem>>) attributes {dimension_semantics = [#tpu.dimension_semantics<parallel>], iteration_bounds = array<i64: 2>, scalar_prefetch = 0 : i64, scratch_operands = 0 : i64, tpu.core_type = #tpu.core_type<tc>, window_params = [{transform_indices = @transform_0, window_bounds = array<i64: 1, 8, 32>}, {transform_indices = @transform_1, window_bounds = array<i64: 1, 8, 32>}, {transform_indices = @transform_2, window_bounds = array<i64: 1, 8, 32>}, {transform_indices = @transform_3, window_bounds = array<i64: 1, 8, 32>}]} {
    %c0 = arith.constant 0 : index
    %c0_0 = arith.constant 0 : index
    %c0_1 = arith.constant 0 : index
    %0 = vector.load %arg1[%c0, %c0_0, %c0_1] : memref<1x8x32xf32, #tpu.memory_space<vmem>>, vector<1x8x32xf32>
    %1 = vector.shape_cast %0 : vector<1x8x32xf32> to vector<8x32xf32>
    %c0_2 = arith.constant 0 : index
    %c0_3 = arith.constant 0 : index
    %c0_4 = arith.constant 0 : index
    %2 = vector.load %arg2[%c0_2, %c0_3, %c0_4] : memref<1x8x32xf32, #tpu.memory_space<vmem>>, vector<1x8x32xf32>
    %3 = vector.shape_cast %2 : vector<1x8x32xf32> to vector<8x32xf32>
    %c0_5 = arith.constant 0 : index
    %c0_6 = arith.constant 0 : index
    %c0_7 = arith.constant 0 : index
    %4 = vector.load %arg3[%c0_5, %c0_6, %c0_7] : memref<1x8x32xf32, #tpu.memory_space<vmem>>, vector<1x8x32xf32>
    %5 = vector.shape_cast %4 : vector<1x8x32xf32> to vector<8x32xf32>
    %6 = vector.extract_strided_slice %1 {offsets = [0, 0], sizes = [8, 8], strides = [1, 1]} : vector<8x32xf32> to vector<8x8xf32>
    %7 = arith.truncf %6 : vector<8x8xf32> to vector<8x8xbf16>
    %8 = vector.extract_strided_slice %3 {offsets = [0, 0], sizes = [8, 8], strides = [1, 1]} : vector<8x32xf32> to vector<8x8xf32>
    %9 = arith.truncf %8 : vector<8x8xf32> to vector<8x8xbf16>
    %10 = vector.extract_strided_slice %5 {offsets = [0, 0], sizes = [8, 8], strides = [1, 1]} : vector<8x32xf32> to vector<8x8xf32>
    %11 = arith.truncf %10 : vector<8x8xf32> to vector<8x8xbf16>
    %cst = arith.constant dense<0.000000e+00> : vector<8x8xf32>
    %12 = tpu.matmul %7, %9, %cst {dimension_numbers = #tpu.dot_dimension_numbers<[1], [1], [0], [0], [0, 0, 1, 0], [], []>} : vector<8x8xbf16>, vector<8x8xbf16>, vector<8x8xf32> -> vector<8x8xf32>
    %cst_8 = arith.constant 0.353553385 : f32
    %13 = vector.broadcast %cst_8 : f32 to vector<8x8xf32>
    %14 = arith.mulf %12, %13 : vector<8x8xf32>
    %cst_9 = arith.constant dense<0xFF800000> : vector<8xf32>
    %15 = vector.multi_reduction <maximumf>, %14, %cst_9 [1] : vector<8x8xf32> to vector<8xf32>
    %16 = vector.shape_cast %15 : vector<8xf32> to vector<8x1xf32>
    %17 = vector.broadcast %16 : vector<8x1xf32> to vector<8x8xf32>
    %18 = arith.subf %14, %17 : vector<8x8xf32>
    %19 = math.exp %18 : vector<8x8xf32>
    %cst_10 = arith.constant dense<0.000000e+00> : vector<8xf32>
    %20 = vector.multi_reduction <add>, %19, %cst_10 [1] : vector<8x8xf32> to vector<8xf32>
    %21 = vector.shape_cast %20 : vector<8xf32> to vector<8x1xf32>
    %22 = tpu.reciprocal %21 {approx = true} : vector<8x1xf32> -> vector<8x1xf32>
    %23 = vector.broadcast %22 : vector<8x1xf32> to vector<8x8xf32>
    %24 = arith.mulf %19, %23 : vector<8x8xf32>
    %25 = arith.truncf %24 : vector<8x8xf32> to vector<8x8xbf16>
    %cst_11 = arith.constant dense<0.000000e+00> : vector<8x8xf32>
    %26 = tpu.matmul %25, %11, %cst_11 {dimension_numbers = #tpu.dot_dimension_numbers<[1], [0], [0], [1], [0, 0, 1, 1], [], []>} : vector<8x8xbf16>, vector<8x8xbf16>, vector<8x8xf32> -> vector<8x8xf32>
    %27 = vector.extract_strided_slice %1 {offsets = [0, 8], sizes = [8, 8], strides = [1, 1]} : vector<8x32xf32> to vector<8x8xf32>
    %28 = arith.truncf %27 : vector<8x8xf32> to vector<8x8xbf16>
    %29 = vector.extract_strided_slice %3 {offsets = [0, 8], sizes = [8, 8], strides = [1, 1]} : vector<8x32xf32> to vector<8x8xf32>
    %30 = arith.truncf %29 : vector<8x8xf32> to vector<8x8xbf16>
    %31 = vector.extract_strided_slice %5 {offsets = [0, 8], sizes = [8, 8], strides = [1, 1]} : vector<8x32xf32> to vector<8x8xf32>
    %32 = arith.truncf %31 : vector<8x8xf32> to vector<8x8xbf16>
    %cst_12 = arith.constant dense<0.000000e+00> : vector<8x8xf32>
    %33 = tpu.matmul %28, %30, %cst_12 {dimension_numbers = #tpu.dot_dimension_numbers<[1], [1], [0], [0], [0, 0, 1, 0], [], []>} : vector<8x8xbf16>, vector<8x8xbf16>, vector<8x8xf32> -> vector<8x8xf32>
    %cst_13 = arith.constant 0.353553385 : f32
    %34 = vector.broadcast %cst_13 : f32 to vector<8x8xf32>
    %35 = arith.mulf %33, %34 : vector<8x8xf32>
    %cst_14 = arith.constant dense<0xFF800000> : vector<8xf32>
    %36 = vector.multi_reduction <maximumf>, %35, %cst_14 [1] : vector<8x8xf32> to vector<8xf32>
    %37 = vector.shape_cast %36 : vector<8xf32> to vector<8x1xf32>
    %38 = vector.broadcast %37 : vector<8x1xf32> to vector<8x8xf32>
    %39 = arith.subf %35, %38 : vector<8x8xf32>
    %40 = math.exp %39 : vector<8x8xf32>
    %cst_15 = arith.constant dense<0.000000e+00> : vector<8xf32>
    %41 = vector.multi_reduction <add>, %40, %cst_15 [1] : vector<8x8xf32> to vector<8xf32>
    %42 = vector.shape_cast %41 : vector<8xf32> to vector<8x1xf32>
    %43 = tpu.reciprocal %42 {approx = true} : vector<8x1xf32> -> vector<8x1xf32>
    %44 = vector.broadcast %43 : vector<8x1xf32> to vector<8x8xf32>
    %45 = arith.mulf %40, %44 : vector<8x8xf32>
    %46 = arith.truncf %45 : vector<8x8xf32> to vector<8x8xbf16>
    %cst_16 = arith.constant dense<0.000000e+00> : vector<8x8xf32>
    %47 = tpu.matmul %46, %32, %cst_16 {dimension_numbers = #tpu.dot_dimension_numbers<[1], [0], [0], [1], [0, 0, 1, 1], [], []>} : vector<8x8xbf16>, vector<8x8xbf16>, vector<8x8xf32> -> vector<8x8xf32>
    %48 = vector.extract_strided_slice %1 {offsets = [0, 16], sizes = [8, 8], strides = [1, 1]} : vector<8x32xf32> to vector<8x8xf32>
    %49 = arith.truncf %48 : vector<8x8xf32> to vector<8x8xbf16>
    %50 = vector.extract_strided_slice %3 {offsets = [0, 16], sizes = [8, 8], strides = [1, 1]} : vector<8x32xf32> to vector<8x8xf32>
    %51 = arith.truncf %50 : vector<8x8xf32> to vector<8x8xbf16>
    %52 = vector.extract_strided_slice %5 {offsets = [0, 16], sizes = [8, 8], strides = [1, 1]} : vector<8x32xf32> to vector<8x8xf32>
    %53 = arith.truncf %52 : vector<8x8xf32> to vector<8x8xbf16>
    %cst_17 = arith.constant dense<0.000000e+00> : vector<8x8xf32>
    %54 = tpu.matmul %49, %51, %cst_17 {dimension_numbers = #tpu.dot_dimension_numbers<[1], [1], [0], [0], [0, 0, 1, 0], [], []>} : vector<8x8xbf16>, vector<8x8xbf16>, vector<8x8xf32> -> vector<8x8xf32>
    %cst_18 = arith.constant 0.353553385 : f32
    %55 = vector.broadcast %cst_18 : f32 to vector<8x8xf32>
    %56 = arith.mulf %54, %55 : vector<8x8xf32>
    %cst_19 = arith.constant dense<0xFF800000> : vector<8xf32>
    %57 = vector.multi_reduction <maximumf>, %56, %cst_19 [1] : vector<8x8xf32> to vector<8xf32>
    %58 = vector.shape_cast %57 : vector<8xf32> to vector<8x1xf32>
    %59 = vector.broadcast %58 : vector<8x1xf32> to vector<8x8xf32>
    %60 = arith.subf %56, %59 : vector<8x8xf32>
    %61 = math.exp %60 : vector<8x8xf32>
    %cst_20 = arith.constant dense<0.000000e+00> : vector<8xf32>
    %62 = vector.multi_reduction <add>, %61, %cst_20 [1] : vector<8x8xf32> to vector<8xf32>
    %63 = vector.shape_cast %62 : vector<8xf32> to vector<8x1xf32>
    %64 = tpu.reciprocal %63 {approx = true} : vector<8x1xf32> -> vector<8x1xf32>
    %65 = vector.broadcast %64 : vector<8x1xf32> to vector<8x8xf32>
    %66 = arith.mulf %61, %65 : vector<8x8xf32>
    %67 = arith.truncf %66 : vector<8x8xf32> to vector<8x8xbf16>
    %cst_21 = arith.constant dense<0.000000e+00> : vector<8x8xf32>
    %68 = tpu.matmul %67, %53, %cst_21 {dimension_numbers = #tpu.dot_dimension_numbers<[1], [0], [0], [1], [0, 0, 1, 1], [], []>} : vector<8x8xbf16>, vector<8x8xbf16>, vector<8x8xf32> -> vector<8x8xf32>
    %69 = vector.extract_strided_slice %1 {offsets = [0, 24], sizes = [8, 8], strides = [1, 1]} : vector<8x32xf32> to vector<8x8xf32>
    %70 = arith.truncf %69 : vector<8x8xf32> to vector<8x8xbf16>
    %71 = vector.extract_strided_slice %3 {offsets = [0, 24], sizes = [8, 8], strides = [1, 1]} : vector<8x32xf32> to vector<8x8xf32>
    %72 = arith.truncf %71 : vector<8x8xf32> to vector<8x8xbf16>
    %73 = vector.extract_strided_slice %5 {offsets = [0, 24], sizes = [8, 8], strides = [1, 1]} : vector<8x32xf32> to vector<8x8xf32>
    %74 = arith.truncf %73 : vector<8x8xf32> to vector<8x8xbf16>
    %cst_22 = arith.constant dense<0.000000e+00> : vector<8x8xf32>
    %75 = tpu.matmul %70, %72, %cst_22 {dimension_numbers = #tpu.dot_dimension_numbers<[1], [1], [0], [0], [0, 0, 1, 0], [], []>} : vector<8x8xbf16>, vector<8x8xbf16>, vector<8x8xf32> -> vector<8x8xf32>
    %cst_23 = arith.constant 0.353553385 : f32
    %76 = vector.broadcast %cst_23 : f32 to vector<8x8xf32>
    %77 = arith.mulf %75, %76 : vector<8x8xf32>
    %cst_24 = arith.constant dense<0xFF800000> : vector<8xf32>
    %78 = vector.multi_reduction <maximumf>, %77, %cst_24 [1] : vector<8x8xf32> to vector<8xf32>
    %79 = vector.shape_cast %78 : vector<8xf32> to vector<8x1xf32>
    %80 = vector.broadcast %79 : vector<8x1xf32> to vector<8x8xf32>
    %81 = arith.subf %77, %80 : vector<8x8xf32>
    %82 = math.exp %81 : vector<8x8xf32>
    %cst_25 = arith.constant dense<0.000000e+00> : vector<8xf32>
    %83 = vector.multi_reduction <add>, %82, %cst_25 [1] : vector<8x8xf32> to vector<8xf32>
    %84 = vector.shape_cast %83 : vector<8xf32> to vector<8x1xf32>
    %85 = tpu.reciprocal %84 {approx = true} : vector<8x1xf32> -> vector<8x1xf32>
    %86 = vector.broadcast %85 : vector<8x1xf32> to vector<8x8xf32>
    %87 = arith.mulf %82, %86 : vector<8x8xf32>
    %88 = arith.truncf %87 : vector<8x8xf32> to vector<8x8xbf16>
    %cst_26 = arith.constant dense<0.000000e+00> : vector<8x8xf32>
    %89 = tpu.matmul %88, %74, %cst_26 {dimension_numbers = #tpu.dot_dimension_numbers<[1], [0], [0], [1], [0, 0, 1, 1], [], []>} : vector<8x8xbf16>, vector<8x8xbf16>, vector<8x8xf32> -> vector<8x8xf32>
    %90 = tpu.concatenate %26, %47, %68, %89 in 1 : vector<8x8xf32>, vector<8x8xf32>, vector<8x8xf32>, vector<8x8xf32> -> vector<8x32xf32>
    %c0_27 = arith.constant 0 : index
    %c0_28 = arith.constant 0 : index
    %c0_29 = arith.constant 0 : index
    %91 = vector.load %arg4[%c0_27, %c0_28, %c0_29] : memref<1x8x32xf32, #tpu.memory_space<vmem>>, vector<1x8x32xf32>
    %92 = vector.shape_cast %91 : vector<1x8x32xf32> to vector<8x32xf32>
    %93 = vector.shape_cast %90 : vector<8x32xf32> to vector<1x8x32xf32>
    tpu.vector_store %arg4[%c0_27, %c0_28, %c0_29], %93 {strides = array<i32>} : memref<1x8x32xf32, #tpu.memory_space<vmem>>, vector<1x8x32xf32>,
    return
  }
  func.func @transform_0(%arg0: i32) -> (i32, i32, i32) {
    %c0_i32 = arith.constant 0 : i32
    %c0_i32_0 = arith.constant 0 : i32
    %c0_i32_1 = arith.constant 0 : i32
    return %arg0, %c0_i32, %c0_i32_0 : i32, i32, i32
  }
  func.func @transform_1(%arg0: i32) -> (i32, i32, i32) {
    %c0_i32 = arith.constant 0 : i32
    %c0_i32_0 = arith.constant 0 : i32
    %c0_i32_1 = arith.constant 0 : i32
    return %arg0, %c0_i32, %c0_i32_0 : i32, i32, i32
  }
  func.func @transform_2(%arg0: i32) -> (i32, i32, i32) {
    %c0_i32 = arith.constant 0 : i32
    %c0_i32_0 = arith.constant 0 : i32
    %c0_i32_1 = arith.constant 0 : i32
    return %arg0, %c0_i32, %c0_i32_0 : i32, i32, i32
  }
  func.func @transform_3(%arg0: i32) -> (i32, i32, i32) {
    %c0_i32 = arith.constant 0 : i32
    %c0_i32_0 = arith.constant 0 : i32
    %c0_i32_1 = arith.constant 0 : i32
    return %arg0, %c0_i32, %c0_i32_0 : i32, i32, i32
  }
}

module attributes {stable_mosaic.version = 11 : i64} {
  func.func @_ln_mm_kernel(%arg0: i32, %arg1: i32, %arg2: memref<16x32xf32, #tpu.memory_space<vmem>>, %arg3: memref<1x32xf32, #tpu.memory_space<vmem>>, %arg4: memref<1x32xf32, #tpu.memory_space<vmem>>, %arg5: memref<32x64xbf16, #tpu.memory_space<vmem>>, %arg6: memref<1x64xf32, #tpu.memory_space<vmem>>, %arg7: memref<16x64xf32, #tpu.memory_space<vmem>>) attributes {dimension_semantics = [#tpu.dimension_semantics<parallel>, #tpu.dimension_semantics<parallel>], iteration_bounds = array<i64: 1, 1>, scalar_prefetch = 0 : i64, scratch_operands = 0 : i64, tpu.core_type = #tpu.core_type<tc>, window_params = [{transform_indices = @transform_0, window_bounds = array<i64: 16, 32>}, {pipeline_mode = #tpu.pipeline_mode<synchronous>, transform_indices = @transform_1, window_bounds = array<i64: 1, 32>}, {pipeline_mode = #tpu.pipeline_mode<synchronous>, transform_indices = @transform_2, window_bounds = array<i64: 1, 32>}, {transform_indices = @transform_3, window_bounds = array<i64: 32, 64>}, {transform_indices = @transform_4, window_bounds = array<i64: 1, 64>}, {transform_indices = @transform_5, window_bounds = array<i64: 16, 64>}]} {
    %c0 = arith.constant 0 : index
    %c0_0 = arith.constant 0 : index
    %0 = vector.load %arg2[%c0, %c0_0] : memref<16x32xf32, #tpu.memory_space<vmem>>, vector<16x32xf32>
    %cst = arith.constant dense<0.000000e+00> : vector<16xf32>
    %1 = vector.multi_reduction <add>, %0, %cst [1] : vector<16x32xf32> to vector<16xf32>
    %2 = vector.shape_cast %1 : vector<16xf32> to vector<16x1xf32>
    %cst_1 = arith.constant 3.200000e+01 : f32
    %3 = vector.broadcast %cst_1 : f32 to vector<16x1xf32>
    %4 = arith.divf %2, %3 : vector<16x1xf32>
    %5 = vector.broadcast %4 : vector<16x1xf32> to vector<16x32xf32>
    %6 = arith.subf %0, %5 : vector<16x32xf32>
    %7 = arith.mulf %6, %6 : vector<16x32xf32>
    %cst_2 = arith.constant dense<0.000000e+00> : vector<16xf32>
    %8 = vector.multi_reduction <add>, %7, %cst_2 [1] : vector<16x32xf32> to vector<16xf32>
    %9 = vector.shape_cast %8 : vector<16xf32> to vector<16x1xf32>
    %cst_3 = arith.constant 3.200000e+01 : f32
    %10 = vector.broadcast %cst_3 : f32 to vector<16x1xf32>
    %11 = arith.divf %9, %10 : vector<16x1xf32>
    %cst_4 = arith.constant 9.99999974E-6 : f32
    %12 = vector.broadcast %cst_4 : f32 to vector<16x1xf32>
    %13 = arith.addf %11, %12 : vector<16x1xf32>
    %14 = math.rsqrt %13 : vector<16x1xf32>
    %15 = vector.broadcast %4 : vector<16x1xf32> to vector<16x32xf32>
    %16 = arith.subf %0, %15 : vector<16x32xf32>
    %17 = vector.broadcast %14 : vector<16x1xf32> to vector<16x32xf32>
    %18 = arith.mulf %16, %17 : vector<16x32xf32>
    %c0_5 = arith.constant 0 : index
    %c0_6 = arith.constant 0 : index
    %19 = vector.load %arg3[%c0_5, %c0_6] : memref<1x32xf32, #tpu.memory_space<vmem>>, vector<1x32xf32>
    %20 = vector.broadcast %19 : vector<1x32xf32> to vector<16x32xf32>
    %21 = arith.mulf %18, %20 : vector<16x32xf32>
    %c0_7 = arith.constant 0 : index
    %c0_8 = arith.constant 0 : index
    %22 = vector.load %arg4[%c0_7, %c0_8] : memref<1x32xf32, #tpu.memory_space<vmem>>, vector<1x32xf32>
    %23 = vector.broadcast %22 : vector<1x32xf32> to vector<16x32xf32>
    %24 = arith.addf %21, %23 : vector<16x32xf32>
    %25 = arith.truncf %24 : vector<16x32xf32> to vector<16x32xbf16>
    %c0_9 = arith.constant 0 : index
    %c0_10 = arith.constant 0 : index
    %26 = vector.load %arg5[%c0_9, %c0_10] : memref<32x64xbf16, #tpu.memory_space<vmem>>, vector<32x64xbf16>
    %cst_11 = arith.constant dense<0.000000e+00> : vector<16x64xf32>
    %27 = tpu.matmul %25, %26, %cst_11 {dimension_numbers = #tpu.dot_dimension_numbers<[1], [0], [0], [1], [0, 0, 1, 1], [], []>} : vector<16x32xbf16>, vector<32x64xbf16>, vector<16x64xf32> -> vector<16x64xf32>
    %c0_12 = arith.constant 0 : index
    %c0_13 = arith.constant 0 : index
    %28 = vector.load %arg6[%c0_12, %c0_13] : memref<1x64xf32, #tpu.memory_space<vmem>>, vector<1x64xf32>
    %29 = vector.broadcast %28 : vector<1x64xf32> to vector<16x64xf32>
    %30 = arith.addf %27, %29 : vector<16x64xf32>
    %cst_14 = arith.constant 0.000000e+00 : f32
    %31 = vector.broadcast %cst_14 : f32 to vector<16x64xf32>
    %32 = arith.maximumf %30, %31 : vector<16x64xf32>
    %c0_15 = arith.constant 0 : index
    %c0_16 = arith.constant 0 : index
    %33 = vector.load %arg7[%c0_15, %c0_16] : memref<16x64xf32, #tpu.memory_space<vmem>>, vector<16x64xf32>
    tpu.vector_store %arg7[%c0_15, %c0_16], %32 {strides = array<i32>} : memref<16x64xf32, #tpu.memory_space<vmem>>, vector<16x64xf32>,
    return
  }
  func.func @transform_0(%arg0: i32, %arg1: i32) -> (i32, i32) {
    %c0_i32 = arith.constant 0 : i32
    %c0_i32_0 = arith.constant 0 : i32
    return %arg0, %c0_i32 : i32, i32
  }
  func.func @transform_1(%arg0: i32, %arg1: i32) -> (i32, i32) {
    %c0_i32 = arith.constant 0 : i32
    %c0_i32_0 = arith.constant 0 : i32
    %c0_i32_1 = arith.constant 0 : i32
    return %c0_i32, %c0_i32_0 : i32, i32
  }
  func.func @transform_2(%arg0: i32, %arg1: i32) -> (i32, i32) {
    %c0_i32 = arith.constant 0 : i32
    %c0_i32_0 = arith.constant 0 : i32
    %c0_i32_1 = arith.constant 0 : i32
    return %c0_i32, %c0_i32_0 : i32, i32
  }
  func.func @transform_3(%arg0: i32, %arg1: i32) -> (i32, i32) {
    %c0_i32 = arith.constant 0 : i32
    %c0_i32_0 = arith.constant 0 : i32
    return %c0_i32, %arg1 : i32, i32
  }
  func.func @transform_4(%arg0: i32, %arg1: i32) -> (i32, i32) {
    %c0_i32 = arith.constant 0 : i32
    %c0_i32_0 = arith.constant 0 : i32
    return %c0_i32, %arg1 : i32, i32
  }
  func.func @transform_5(%arg0: i32, %arg1: i32) -> (i32, i32) {
    %c0_i32 = arith.constant 0 : i32
    return %arg0, %arg1 : i32, i32
  }
}

module attributes {stable_mosaic.version = 11 : i64} {
  func.func @_mm_kernel(%arg0: i32, %arg1: i32, %arg2: i32, %arg3: memref<16x64xf32, #tpu.memory_space<vmem>>, %arg4: memref<64x32xbf16, #tpu.memory_space<vmem>>, %arg5: memref<1x32xf32, #tpu.memory_space<vmem>>, %arg6: memref<16x32xf32, #tpu.memory_space<vmem>>, %arg7: memref<16x32xf32, #tpu.memory_space<vmem>>, %arg8: memref<16x32xf32, #tpu.memory_space<vmem>>) attributes {dimension_semantics = [#tpu.dimension_semantics<parallel>, #tpu.dimension_semantics<parallel>, #tpu.dimension_semantics<arbitrary>], iteration_bounds = array<i64: 1, 1, 1>, scalar_prefetch = 0 : i64, scratch_operands = 1 : i64, tpu.core_type = #tpu.core_type<tc>, window_params = [{transform_indices = @transform_0, window_bounds = array<i64: 16, 64>}, {transform_indices = @transform_1, window_bounds = array<i64: 64, 32>}, {transform_indices = @transform_2, window_bounds = array<i64: 1, 32>}, {transform_indices = @transform_3, window_bounds = array<i64: 16, 32>}, {transform_indices = @transform_4, window_bounds = array<i64: 16, 32>}]} {
    %c0_i32 = arith.constant 0 : i32
    %0 = arith.cmpi eq, %arg2, %c0_i32 : i32
    %1 = arith.extui %0 : i1 to i32
    %c0_i32_0 = arith.constant 0 : i32
    %2 = arith.cmpi ne, %1, %c0_i32_0 : i32
    scf.if %2 {
      %cst_10 = arith.constant 0.000000e+00 : f32
      %13 = vector.broadcast %cst_10 : f32 to vector<16x32xf32>
      %c0_11 = arith.constant 0 : index
      %c0_12 = arith.constant 0 : index
      %14 = vector.load %arg8[%c0_11, %c0_12] : memref<16x32xf32, #tpu.memory_space<vmem>>, vector<16x32xf32>
      tpu.vector_store %arg8[%c0_11, %c0_12], %13 {strides = array<i32>} : memref<16x32xf32, #tpu.memory_space<vmem>>, vector<16x32xf32>,
    } else {
    }
    %c0 = arith.constant 0 : index
    %c0_1 = arith.constant 0 : index
    %3 = vector.load %arg3[%c0, %c0_1] : memref<16x64xf32, #tpu.memory_space<vmem>>, vector<16x64xf32>
    %4 = arith.truncf %3 : vector<16x64xf32> to vector<16x64xbf16>
    %c0_2 = arith.constant 0 : index
    %c0_3 = arith.constant 0 : index
    %5 = vector.load %arg4[%c0_2, %c0_3] : memref<64x32xbf16, #tpu.memory_space<vmem>>, vector<64x32xbf16>
    %c0_4 = arith.constant 0 : index
    %c0_5 = arith.constant 0 : index
    %6 = vector.load %arg8[%c0_4, %c0_5] : memref<16x32xf32, #tpu.memory_space<vmem>>, vector<16x32xf32>
    %cst = arith.constant dense<0.000000e+00> : vector<16x32xf32>
    %7 = tpu.matmul %4, %5, %cst {dimension_numbers = #tpu.dot_dimension_numbers<[1], [0], [0], [1], [0, 0, 1, 1], [], []>} : vector<16x64xbf16>, vector<64x32xbf16>, vector<16x32xf32> -> vector<16x32xf32>
    %8 = arith.addf %6, %7 : vector<16x32xf32>
    %c0_6 = arith.constant 0 : index
    %c0_7 = arith.constant 0 : index
    %9 = vector.load %arg8[%c0_6, %c0_7] : memref<16x32xf32, #tpu.memory_space<vmem>>, vector<16x32xf32>
    tpu.vector_store %arg8[%c0_6, %c0_7], %8 {strides = array<i32>} : memref<16x32xf32, #tpu.memory_space<vmem>>, vector<16x32xf32>,
    %c0_i32_8 = arith.constant 0 : i32
    %10 = arith.cmpi eq, %arg2, %c0_i32_8 : i32
    %11 = arith.extui %10 : i1 to i32
    %c0_i32_9 = arith.constant 0 : i32
    %12 = arith.cmpi ne, %11, %c0_i32_9 : i32
    scf.if %12 {
      %c0_10 = arith.constant 0 : index
      %c0_11 = arith.constant 0 : index
      %13 = vector.load %arg8[%c0_10, %c0_11] : memref<16x32xf32, #tpu.memory_space<vmem>>, vector<16x32xf32>
      %c0_12 = arith.constant 0 : index
      %c0_13 = arith.constant 0 : index
      %14 = vector.load %arg5[%c0_12, %c0_13] : memref<1x32xf32, #tpu.memory_space<vmem>>, vector<1x32xf32>
      %15 = vector.broadcast %14 : vector<1x32xf32> to vector<16x32xf32>
      %16 = arith.addf %13, %15 : vector<16x32xf32>
      %c0_14 = arith.constant 0 : index
      %c0_15 = arith.constant 0 : index
      %17 = vector.load %arg6[%c0_14, %c0_15] : memref<16x32xf32, #tpu.memory_space<vmem>>, vector<16x32xf32>
      %18 = arith.addf %16, %17 : vector<16x32xf32>
      %c0_16 = arith.constant 0 : index
      %c0_17 = arith.constant 0 : index
      %19 = vector.load %arg7[%c0_16, %c0_17] : memref<16x32xf32, #tpu.memory_space<vmem>>, vector<16x32xf32>
      tpu.vector_store %arg7[%c0_16, %c0_17], %18 {strides = array<i32>} : memref<16x32xf32, #tpu.memory_space<vmem>>, vector<16x32xf32>,
    } else {
    }
    return
  }
  func.func @transform_0(%arg0: i32, %arg1: i32, %arg2: i32) -> (i32, i32) {
    %c0_i32 = arith.constant 0 : i32
    return %arg0, %arg2 : i32, i32
  }
  func.func @transform_1(%arg0: i32, %arg1: i32, %arg2: i32) -> (i32, i32) {
    %c0_i32 = arith.constant 0 : i32
    return %arg2, %arg1 : i32, i32
  }
  func.func @transform_2(%arg0: i32, %arg1: i32, %arg2: i32) -> (i32, i32) {
    %c0_i32 = arith.constant 0 : i32
    %c0_i32_0 = arith.constant 0 : i32
    return %c0_i32, %arg1 : i32, i32
  }
  func.func @transform_3(%arg0: i32, %arg1: i32, %arg2: i32) -> (i32, i32) {
    %c0_i32 = arith.constant 0 : i32
    return %arg0, %arg1 : i32, i32
  }
  func.func @transform_4(%arg0: i32, %arg1: i32, %arg2: i32) -> (i32, i32) {
    %c0_i32 = arith.constant 0 : i32
    return %arg0, %arg1 : i32, i32
  }
}

module attributes {stable_mosaic.version = 11 : i64} {
  func.func @_ln_kernel(%arg0: i32, %arg1: memref<16x32xf32, #tpu.memory_space<vmem>>, %arg2: memref<1x32xf32, #tpu.memory_space<vmem>>, %arg3: memref<1x32xf32, #tpu.memory_space<vmem>>, %arg4: memref<16x32xf32, #tpu.memory_space<vmem>>) attributes {dimension_semantics = [#tpu.dimension_semantics<parallel>], iteration_bounds = array<i64: 1>, scalar_prefetch = 0 : i64, scratch_operands = 0 : i64, tpu.core_type = #tpu.core_type<tc>, window_params = [{transform_indices = @transform_0, window_bounds = array<i64: 16, 32>}, {pipeline_mode = #tpu.pipeline_mode<synchronous>, transform_indices = @transform_1, window_bounds = array<i64: 1, 32>}, {pipeline_mode = #tpu.pipeline_mode<synchronous>, transform_indices = @transform_2, window_bounds = array<i64: 1, 32>}, {transform_indices = @transform_3, window_bounds = array<i64: 16, 32>}]} {
    %c0 = arith.constant 0 : index
    %c0_0 = arith.constant 0 : index
    %0 = vector.load %arg1[%c0, %c0_0] : memref<16x32xf32, #tpu.memory_space<vmem>>, vector<16x32xf32>
    %cst = arith.constant dense<0.000000e+00> : vector<16xf32>
    %1 = vector.multi_reduction <add>, %0, %cst [1] : vector<16x32xf32> to vector<16xf32>
    %2 = vector.shape_cast %1 : vector<16xf32> to vector<16x1xf32>
    %cst_1 = arith.constant 3.200000e+01 : f32
    %3 = vector.broadcast %cst_1 : f32 to vector<16x1xf32>
    %4 = arith.divf %2, %3 : vector<16x1xf32>
    %5 = vector.broadcast %4 : vector<16x1xf32> to vector<16x32xf32>
    %6 = arith.subf %0, %5 : vector<16x32xf32>
    %7 = arith.mulf %6, %6 : vector<16x32xf32>
    %cst_2 = arith.constant dense<0.000000e+00> : vector<16xf32>
    %8 = vector.multi_reduction <add>, %7, %cst_2 [1] : vector<16x32xf32> to vector<16xf32>
    %9 = vector.shape_cast %8 : vector<16xf32> to vector<16x1xf32>
    %cst_3 = arith.constant 3.200000e+01 : f32
    %10 = vector.broadcast %cst_3 : f32 to vector<16x1xf32>
    %11 = arith.divf %9, %10 : vector<16x1xf32>
    %cst_4 = arith.constant 9.99999974E-6 : f32
    %12 = vector.broadcast %cst_4 : f32 to vector<16x1xf32>
    %13 = arith.addf %11, %12 : vector<16x1xf32>
    %14 = math.rsqrt %13 : vector<16x1xf32>
    %15 = vector.broadcast %4 : vector<16x1xf32> to vector<16x32xf32>
    %16 = arith.subf %0, %15 : vector<16x32xf32>
    %17 = vector.broadcast %14 : vector<16x1xf32> to vector<16x32xf32>
    %18 = arith.mulf %16, %17 : vector<16x32xf32>
    %c0_5 = arith.constant 0 : index
    %c0_6 = arith.constant 0 : index
    %19 = vector.load %arg2[%c0_5, %c0_6] : memref<1x32xf32, #tpu.memory_space<vmem>>, vector<1x32xf32>
    %20 = vector.broadcast %19 : vector<1x32xf32> to vector<16x32xf32>
    %21 = arith.mulf %18, %20 : vector<16x32xf32>
    %c0_7 = arith.constant 0 : index
    %c0_8 = arith.constant 0 : index
    %22 = vector.load %arg3[%c0_7, %c0_8] : memref<1x32xf32, #tpu.memory_space<vmem>>, vector<1x32xf32>
    %23 = vector.broadcast %22 : vector<1x32xf32> to vector<16x32xf32>
    %24 = arith.addf %21, %23 : vector<16x32xf32>
    %c0_9 = arith.constant 0 : index
    %c0_10 = arith.constant 0 : index
    %25 = vector.load %arg4[%c0_9, %c0_10] : memref<16x32xf32, #tpu.memory_space<vmem>>, vector<16x32xf32>
    tpu.vector_store %arg4[%c0_9, %c0_10], %24 {strides = array<i32>} : memref<16x32xf32, #tpu.memory_space<vmem>>, vector<16x32xf32>,
    return
  }
  func.func @transform_0(%arg0: i32) -> (i32, i32) {
    %c0_i32 = arith.constant 0 : i32
    %c0_i32_0 = arith.constant 0 : i32
    return %arg0, %c0_i32 : i32, i32
  }
  func.func @transform_1(%arg0: i32) -> (i32, i32) {
    %c0_i32 = arith.constant 0 : i32
    %c0_i32_0 = arith.constant 0 : i32
    %c0_i32_1 = arith.constant 0 : i32
    return %c0_i32, %c0_i32_0 : i32, i32
  }
  func.func @transform_2(%arg0: i32) -> (i32, i32) {
    %c0_i32 = arith.constant 0 : i32
    %c0_i32_0 = arith.constant 0 : i32
    %c0_i32_1 = arith.constant 0 : i32
    return %c0_i32, %c0_i32_0 : i32, i32
  }
  func.func @transform_3(%arg0: i32) -> (i32, i32) {
    %c0_i32 = arith.constant 0 : i32
    %c0_i32_0 = arith.constant 0 : i32
    return %arg0, %c0_i32 : i32, i32
  }
}

</mosaic_0001>

<bundles_post_ra>
// kernel: encoder_forward.11
= control target key start
LH: loop header
LB: loop body
LE: loop exit
PB: predicated region body
PF: predicated region fallthrough
CT: control target
= control target key end

     0   :  { %vm23_vm0 = vcmask 261120   ;;  %v169_v15 = vmov 0.0   ;;  %vm170_vm1 = vmmov 0   ;;  %vm137_vm2 = vcmask 785408   ;;  %s233_s0 = inlined_call_operand.vmem [shape: f32[16,32], index: 0, kind: input, shape index: {}]   ;;  %s234_s3 = inlined_call_operand.vmem [shape: bf16[32,96], index: 3, kind: input, shape index: {}]   ;;  %s235_s1 = inlined_call_operand.vmem [shape: f32[1,32], index: 1, kind: input, shape index: {}]   ;;  %s236_s2 = inlined_call_operand.vmem [shape: f32[1,32], index: 2, kind: input, shape index: {}]   ;;  %s237_s4 = inlined_call_operand.vmem [shape: f32[1,96], index: 4, kind: input, shape index: {}]   ;;  %s238_s5 = inlined_call_operand.vmem [shape: f32[16,96], index: 5, kind: output, shape index: {}]  }
   0x1   :  { %v21_v0 = vld [vmem:[%s233_s0] sm:$0xff]  ;;  %v22_v1 = vld [vmem:[%s233_s0 + $0x8] sm:$0xff]  ;;  %153 = vmatprep.subr.bf16.mxu0 %v169_v15  ;;  %157 = vmatprep.mubr.msk.bf16.mxu0 %vm170_vm1, %v169_v15 }
   0x2   :  { %v24_v2 = vsel %vm23_vm0, %v21_v0, 0.0  ;;  %v27_v3 = vsel %vm23_vm0, %v22_v1, 0.0  ;;  %v163_v14 = vld [vmem:[%s234_s3] sm:$0xff]   ;;  %v164_v16 = vld [vmem:[%s234_s3 + $0x8] sm:$0xff]  }
   0x3   :  { %25 = vadd.xlane.f32.xlu0 %v24_v2  ;;  %154 = vmatpush3.bf16.msra.mxu0 %v163_v14  ;;  %v144_v25 = vld [vmem:[%s235_s1] ss:$0 sm:$0xff] }
   0x4   :  { %155 = vmatprep.subr.bf16.mxu0 %v169_v15  ;;  %v145_v29 = vld [vmem:[%s236_s2] ss:$0 sm:$0xff] }
   0x5   :  { %v146_v34 = vld [vmem:[%s237_s4] ss:$0 sm:$0xff] }
   0x7   :  { %28 = vadd.xlane.f32.xlu0 %v27_v3  ;;  %156 = vmatpush3.bf16.msra.mxu0 %v164_v16 }
  0x90   :  { %v26_v4 = vpop.xlane.xlu0 %25 }
  0x91   :  { %v31_v5 = vmul.f32 0.03125, %v26_v4 }
  0x93   :  { %v33_v6 = vsub.f32 %v21_v0, %v31_v5 }
  0x94   :  { %v29_v7 = vpop.xlane.xlu0 %28 }
  0x95   :  { %v32_v8 = vmul.f32 0.03125, %v29_v7  ;;  %v35_v9 = vmul.f32 %v33_v6, %v33_v6 }
  0x97   :  { %v34_v10 = vsub.f32 %v22_v1, %v32_v8  ;;  %v37_v11 = vsel %vm23_vm0, %v35_v9, 0.0 }
  0x98   :  { %38 = vadd.xlane.f32.xlu1 %v37_v11 }
  0x99   :  { %v36_v12 = vmul.f32 %v34_v10, %v34_v10 }
  0x9b   :  { %v40_v13 = vsel %vm23_vm0, %v36_v12, 0.0 }
  0x9c   :  { %41 = vadd.xlane.f32.xlu1 %v40_v13 }
 0x125   :  { %v39_v17 = vpop.xlane.xlu1 %38 }
 0x126   :  { %v43_v18 = vmul.f32 0.03125, %v39_v17 }
 0x128   :  { %v45_v19 = vadd.f32 1e-05, %v43_v18 }
 0x129   :  { %v42_v20 = vpop.xlane.xlu1 %41 }
 0x12a   :  { %165 = vrsqrt.f32 %v45_v19  ;;  %v44_v21 = vmul.f32 0.03125, %v42_v20 }
 0x12c   :  { %v46_v22 = vadd.f32 1e-05, %v44_v21 }
 0x12e   :  { %167 = vrsqrt.f32 %v46_v22 }
 0x134   :  { %v166_v23 = vpop.eup %165 }
 0x135   :  { %v49_v24 = vmul.f32 %v166_v23, %v33_v6 }
 0x137   :  { %v58_v28 = vmul.f32 %v144_v25, %v49_v24 }
 0x138   :  { %v168_v26 = vpop.eup %167 }
 0x139   :  { %v50_v27 = vmul.f32 %v168_v26, %v34_v10  ;;  %v67_v31 = vadd.f32 %v145_v29, %v58_v28 }
 0x13b   :  { %v59_v30 = vmul.f32 %v144_v25, %v50_v27 }
 0x13d   :  { %v68_v32 = vadd.f32 %v145_v29, %v59_v30 }
 0x13f   :  { %v69_v33 = vpack.c.bf16 %v68_v32, %v67_v31 }
 0x141   :  { %158 = vmatmul.mubr.msk.bf16.vlgmr.msra.gmra.mrb[0].mxu0 %vm23_vm0, %v69_v33 }
 0x214   :  { %v130_v35 = vpop.f32.mrb[0].mxu0 }
 0x215   :  { %v131_v36 = vadd.f32 %v146_v34, %v130_v35  ;;  %v159_v37 = vpop.f32.mrb[1].mxu0 }
 0x216   :  { %v133_v38 = vpop.f32.mrb[2].mxu0 }
 0x217   :  { %138 = vst.msk [vmem:[%s238_s5] sm:$0xff] %vm137_vm2, %v131_v36  ;;  %v134_v39 = vadd.f32 %v146_v34, %v133_v38  ;;  %v160_v40 = vpop.f32.mrb[3].mxu0 }
 0x219   :  { %139 = vst.msk [vmem:[%s238_s5 + $0x8] sm:$0xff] %vm137_vm2, %v134_v39 }

// kernel: encoder_forward.13
= control target key start
LH: loop header
LB: loop body
LE: loop exit
PB: predicated region body
PF: predicated region fallthrough
CT: control target
= control target key end

     0   :  { %vm22_vm0 = vcmask 261120   ;;  %v138_v0 = vmov 0.0   ;;  %vm139_vm1 = vmmov 0   ;;  %s199_s1 = inlined_call_operand.vmem [shape: bf16[32,32], index: 1, kind: input, shape index: {}]   ;;  %s200_s0 = inlined_call_operand.vmem [shape: f32[16,32], index: 0, kind: input, shape index: {}]   ;;  %s201_s2 = inlined_call_operand.vmem [shape: f32[1,32], index: 2, kind: input, shape index: {}]   ;;  %s202_s3 = inlined_call_operand.vmem [shape: f32[16,32], index: 3, kind: input, shape index: {}]   ;;  %s203_s4 = inlined_call_operand.vmem [shape: f32[16,32], index: 4, kind: output, shape index: {}]  }
   0x1   :  { %126 = vmatprep.subr.bf16.mxu0 %v138_v0  ;;  %v136_v1 = vld [vmem:[%s199_s1] sm:$0xff]   ;;  %130 = vmatprep.mubr.msk.bf16.mxu0 %vm139_vm1, %v138_v0  ;;  %23 = vst.msk [vmem:[#allocation2] sm:$0xff] %vm22_vm0, %v138_v0  ;;  %24 = vst.msk [vmem:[#allocation2 + $0x8] sm:$0xff] %vm22_vm0, %v138_v0  ;;  %v137_v2 = vld [vmem:[%s199_s1 + $0x8] sm:$0xff]  }
   0x2   :  { %127 = vmatpush3.bf16.msra.mxu0 %v136_v1  ;;  %v25_v3 = vld [vmem:[%s200_s0] sm:$0xff]  ;;  %v26_v4 = vld [vmem:[%s200_s0 + $0x8] sm:$0xff] }
   0x3   :  { %128 = vmatprep.subr.bf16.mxu0 %v138_v0  ;;  %v27_v5 = vpack.c.bf16 %v26_v4, %v25_v3  ;;  %v122_v14 = vld [vmem:[%s201_s2] ss:$0 sm:$0xff]  ;;  %v110_v19 = vld [vmem:[%s202_s3 + $0x8] sm:$0xff] }
   0x4   :  { %v109_v16 = vld [vmem:[%s202_s3] sm:$0xff] }
   0x6   :  { %129 = vmatpush3.bf16.msra.mxu0 %v137_v2 }
   0x8   :  { %v32_v6 = vld [vmem:[#allocation2] sm:$0xff]  ;;  %v33_v8 = vld [vmem:[#allocation2 + $0x8] sm:$0xff] }
   0x9   :  { %131 = vmatmul.mubr.msk.bf16.vlgmr.msra.gmra.mrb[0].mxu0 %vm22_vm0, %v27_v5 }
  0xdc   :  { %v84_v7 = vpop.f32.mrb[0].mxu0 }
  0xdd   :  { %v91_v9 = vadd.f32 %v84_v7, %v32_v6  ;;  %v132_v10 = vpop.f32.mrb[1].mxu0 }
  0xde   :  { %v87_v11 = vpop.f32.mrb[2].mxu0 }
  0xdf   :  { %93 = vst.msk [vmem:[#allocation2] sm:$0xff] %vm22_vm0, %v91_v9  ;;  %v92_v12 = vadd.f32 %v87_v11, %v33_v8  ;;  %v133_v13 = vpop.f32.mrb[3].mxu0 }
  0xe1   :  { %94 = vst.msk [vmem:[#allocation2 + $0x8] sm:$0xff] %vm22_vm0, %v92_v12 }
  0xe6   :  { %v98_v15 = vld [vmem:[#allocation2] sm:$0xff] }
  0xe7   :  { %v107_v17 = vadd.f32 %v122_v14, %v98_v15 }
  0xe8   :  { %v99_v18 = vld [vmem:[#allocation2 + $0x8] sm:$0xff] }
  0xe9   :  { %v111_v20 = vadd.f32 %v109_v16, %v107_v17  ;;  %v108_v21 = vadd.f32 %v122_v14, %v99_v18 }
  0xeb   :  { %113 = vst.msk [vmem:[%s203_s4] sm:$0xff] %vm22_vm0, %v111_v20  ;;  %v112_v22 = vadd.f32 %v110_v19, %v108_v21 }
  0xed   :  { %114 = vst.msk [vmem:[%s203_s4 + $0x8] sm:$0xff] %vm22_vm0, %v112_v22 }

// kernel: encoder_forward.12
= control target key start
LH: loop header
LB: loop body
LE: loop exit
PB: predicated region body
PF: predicated region fallthrough
CT: control target
= control target key end

     0   :  { %s897_s12 = smov 0   ;;  %s993_s0 = inlined_call_operand.vmem [shape: f32[2,8,32], index: 0, kind: input, shape index: {}]   ;;  %s994_s1 = inlined_call_operand.vmem [shape: f32[2,8,32], index: 1, kind: input, shape index: {}]   ;;  %s995_s2 = inlined_call_operand.vmem [shape: f32[2,8,32], index: 2, kind: input, shape index: {}]   ;;  %s996_s3 = inlined_call_operand.vmem [shape: f32[2,8,32], index: 3, kind: output, shape index: {}]  }
   0x1 LB: > { %s746_s13 = sadd.s32 4294967295, %s867_s12   ;;  %p750_p0 = scmp.ge.s32.totalorder %s867_s12, 1  ;;  %s867_s12 = sphi %s897_s12, %s13_s12  }
   0x2   : > { %p154_p1 = scmp.lt.s32.totalorder %s867_s12, 3 }
   0x4   : > { %p155_p2 = pnand %p750_p0, %p154_p1 }
   0x5   : > { %p184_p3 = scmp.lt.s32.totalorder (!%p155_p2), %s746_s13, 1  ;;  %v869_v0 = vmov (!%p155_p2), 0.0   ;;  %vm870_vm0 = vmmov (!%p155_p2), 0   ;;  %vm207_vm1 = vcmask (!%p155_p2), 64512   ;;  %s871_s21 = smov (!%p155_p2), 120   ;;  %vm270_vm2 = vcmask (!%p155_p2), 1043456  }
   0x6   : > { %158 = sbr.rel (%p155_p2) target bundleno = 1477 (0x5c5), region = 32  ;;  %781 = vmatprep.subr.bf16.mxu0 (!%p155_p2), %v869_v0  ;;  %783 = vmatprep.mubr.msk.bf16.mxu0 (!%p155_p2), %vm870_vm0, %v869_v0  ;;  %s872_s22 = smov (!%p155_p2), 112   ;;  %vm663_vm3 = vcmask (!%p155_p2), 130048   ;;  %vm665_vm4 = vcmask (!%p155_p2), 195584   ;;  %vm667_vm5 = vcmask (!%p155_p2), 261120  }
   0x7   : > { %787 = vmatprep.subr.bf16.mxu1 (!%p155_p2), %v869_v0  ;;  %789 = vmatprep.mubr.msk.bf16.mxu1 (!%p155_p2), %vm870_vm0, %v869_v0  ;;  %s873_s23 = smov (!%p155_p2), 104   ;;  %s874_s27 = smov (!%p155_p2), 8  }
   0x8   : > { %s875_s28 = smov (!%p155_p2), 16   ;;  %s876_s29 = smov (!%p155_p2), 24  }
   0xd   : > { %s998_s13 = smov (!%p184_p3, %s746_s13), 1 }
   0xe   : > { %s911_s14 = sshll.u32 %s998_s13, 3 }
   0xf   : > { %s191_s17 = scalar_lea.vmem %s994_s1, %s911_s14  ;;  %s187_s20 = scalar_lea.vmem %s993_s0, %s911_s14 }
  0x10   : > { %v202_v1 = vld [vmem:[%s191_s17] sm:$0xff]  ;;  %s195_s26 = scalar_lea.vmem %s995_s2, %s911_s14  ;;  %s199_s5 = scalar_lea.vmem %s996_s3, %s911_s14 }
  0x11   : > { %v205_v2 = vpack.c.bf16 %v202_v1, %v202_v1  ;;  %v201_v4 = vld [vmem:[%s187_s20] sm:$0xff] }
  0x12   : > { %v204_v5 = vpack.c.bf16 %v201_v4, %v201_v4  ;;  %v203_v17 = vld [vmem:[%s195_s26] sm:$0xff] }
  0x13   : > { %v212_v3 = vsel %vm207_vm1, %v205_v2, 0  ;;  %318 = vrot.lane.b32.xlu1 %v205_v2, %s871_s21  ;;  %v937_v18 = vpack.c.bf16 %v203_v17, %v203_v17 }
  0x14   : > { %782 = vmatpush3.bf16.xpose.msra.mxu0 %v212_v3 }
  0x15   : > { %799 = vmatprep.subr.bf16.mxu0 %v869_v0  ;;  %v272_v19 = vsel %vm270_vm2, %v937_v18, 0 }
  0x16   : > { %788 = vmatpush3.bf16.msra.mxu1 %v272_v19 }
  0x17   : > { %315 = vrot.lane.b32.xlu1 %v204_v5, %s871_s21  ;;  %793 = vmatprep.subr.bf16.mxu1 %v869_v0 }
  0x1b   : > { %784 = vmatmul.mubr.msk.bf16.vlgmr.msra.gmra.mrb[0].mxu0 %vm207_vm1, %v204_v5  ;;  %428 = vrot.lane.b32.xlu1 %v204_v5, %s872_s22 }
  0x1c   : > { %801 = vmatprep.mubr.msk.bf16.mxu0 %vm870_vm0, %v869_v0 }
  0x1f   : > { %541 = vrot.lane.b32.xlu1 %v205_v2, %s873_s23 }
  0x23   : > { %539 = vrot.lane.b32.xlu1 %v204_v5, %s873_s23 }
  0x85   : > { %v319_v22 = vpop.permute.xlu1 %318 }
  0x86   : > { %v324_v24 = vsel %vm207_vm1, %v319_v22, 0 }
  0x89   : > { %v316_v26 = vpop.permute.xlu1 %315 }
  0x8d   : > { %v429_v28 = vpop.permute.xlu1 %428 }
  0x91   : > { %v542_v30 = vpop.permute.xlu1 %541 }
  0x92   : > { %v547_v31 = vsel %vm207_vm1, %v542_v30, 0 }
  0x95   : > { %v540_v32 = vpop.permute.xlu1 %539 }
  0xee   : > { %v248_v6 = vpop.f32.mrb[0].mxu0 }
  0xef   : > { %v254_v7 = vmul.f32 0.35355338, %v248_v6  ;;  %v785_v8 = vpop.f32.mrb[1].mxu0 }
  0xf0   : > { %v251_v9 = vpop.f32.mrb[2].mxu0 }
  0xf1   : > { %v786_v10 = vpop.f32.mrb[3].mxu0  ;;  %v255_v11 = vsel %vm207_vm1, %v254_v7, -inf }
  0xf2   : > { %256 = vmax.xlane.f32.xlu0 %v255_v11 }
 0x17f   : > { %v257_v12 = vpop.xlane.xlu0 %256 }
 0x180   : > { %v258_v13 = vsub.f32 %v254_v7, %v257_v12 }
 0x182   : > { %v259_v14 = vmul.f32 1.442695, %v258_v13 }
 0x184   : > { %845 = vpow2.f32 %v259_v14 }
 0x18e   : > { %v846_v15 = vpop.eup %845 }
 0x18f   : > { %v261_v16 = vsel %vm207_vm1, %v846_v15, 0.0 }
 0x190   : > { %262 = vadd.xlane.f32.xlu0 %v261_v16 }
 0x1a6   : > { %430 = vrot.lane.b32.xlu0 %v205_v2, %s872_s22 }
 0x21d   : > { %v263_v20 = vpop.xlane.xlu0 %262 }
 0x21e   : > { %847 = vrcp.f32 %v263_v20 }
 0x221   : > { %v431_v27 = vpop.permute.xlu0 %430 }
 0x222   : > { %v436_v29 = vsel %vm207_vm1, %v431_v27, 0 }
 0x228   : > { %v848_v21 = vpop.eup %847 }
 0x229   : > { %v265_v23 = vmul.f32 %v848_v21, %v846_v15 }
 0x22b   : > { %v266_v25 = vpack.c.bf16 %v265_v23, %v265_v23 }
 0x22d   : > { %790 = vmatmul.mubr.msk.bf16.vlgmr.msra.gmra.mrb[0].mxu1 %vm207_vm1, %v266_v25 }
 0x22e   : > { %794 = vmatpush3.bf16.xpose.msra.mxu1 %v324_v24  ;;  %795 = vmatprep.mubr.msk.bf16.mxu1 %vm870_vm0, %v869_v0 }
 0x22f   : > { %805 = vmatprep.subr.bf16.mxu1 %v869_v0 }
 0x235   : > { %796 = vmatmul.mubr.msk.bf16.vlgmr.msra.gmra.mrb[4].mxu1 %vm207_vm1, %v316_v26 }
 0x236   : > { %806 = vmatpush3.bf16.xpose.msra.mxu1 %v436_v29  ;;  %807 = vmatprep.mubr.msk.bf16.mxu1 %vm870_vm0, %v869_v0 }
 0x237   : > { %817 = vmatprep.subr.bf16.mxu1 %v869_v0 }
 0x23d   : > { %808 = vmatmul.mubr.msk.bf16.vlgmr.msra.gmra.mrb[8].mxu1 %vm207_vm1, %v429_v28 }
 0x23e   : > { %818 = vmatpush3.bf16.xpose.msra.mxu1 %v547_v31  ;;  %819 = vmatprep.mubr.msk.bf16.mxu1 %vm870_vm0, %v869_v0 }
 0x245   : > { %820 = vmatmul.mubr.msk.bf16.vlgmr.msra.gmra.mrb[12].mxu1 %vm207_vm1, %v540_v32 }
 0x300   : > { %v958_v33 = vpop.f32.mrb[0].mxu1 }
 0x301   : > { %v791_v34 = vpop.f32.mrb[1].mxu1 }
 0x302   : > { %v311_v35 = vpop.f32.mrb[2].mxu1 }
 0x303   : > { %v792_v36 = vpop.f32.mrb[3].mxu1 }
 0x308   : > { %v360_v37 = vpop.f32.mrb[4].mxu1 }
 0x309   : > { %v366_v38 = vmul.f32 0.35355338, %v360_v37  ;;  %v797_v39 = vpop.f32.mrb[5].mxu1 }
 0x30a   : > { %v363_v40 = vpop.f32.mrb[6].mxu1 }
 0x30b   : > { %v798_v41 = vpop.f32.mrb[7].mxu1  ;;  %v367_v42 = vsel %vm207_vm1, %v366_v38, -inf }
 0x30c   : > { %368 = vmax.xlane.f32.xlu1 %v367_v42 }
 0x310   : > { %v472_v43 = vpop.f32.mrb[8].mxu1 }
 0x311   : > { %v478_v44 = vmul.f32 0.35355338, %v472_v43  ;;  %v809_v45 = vpop.f32.mrb[9].mxu1 }
 0x312   : > { %v475_v46 = vpop.f32.mrb[10].mxu1 }
 0x313   : > { %v479_v47 = vsel %vm207_vm1, %v478_v44, -inf  ;;  %v810_v48 = vpop.f32.mrb[11].mxu1 }
 0x314   : > { %480 = vmax.xlane.f32.xlu0 %v479_v47 }
 0x318   : > { %v583_v49 = vpop.f32.mrb[12].mxu1 }
 0x319   : > { %v589_v50 = vmul.f32 0.35355338, %v583_v49  ;;  %v821_v51 = vpop.f32.mrb[13].mxu1 }
 0x31a   : > { %v586_v52 = vpop.f32.mrb[14].mxu1 }
 0x31b   : > { %v590_v53 = vsel %vm207_vm1, %v589_v50, -inf  ;;  %v822_v54 = vpop.f32.mrb[15].mxu1 }
 0x31c   : > { %591 = vmax.xlane.f32.xlu1 %v590_v53 }
 0x399   : > { %v369_v55 = vpop.xlane.xlu1 %368 }
 0x39a   : > { %v370_v56 = vsub.f32 %v366_v38, %v369_v55 }
 0x39c   : > { %v371_v57 = vmul.f32 1.442695, %v370_v56 }
 0x39e   : > { %849 = vpow2.f32 %v371_v57 }
 0x3a1   : > { %v481_v58 = vpop.xlane.xlu0 %480 }
 0x3a2   : > { %v482_v59 = vsub.f32 %v478_v44, %v481_v58 }
 0x3a4   : > { %v483_v60 = vmul.f32 1.442695, %v482_v59 }
 0x3a6   : > { %851 = vpow2.f32 %v483_v60 }
 0x3a8   : > { %v850_v61 = vpop.eup %849 }
 0x3a9   : > { %v373_v62 = vsel %vm207_vm1, %v850_v61, 0.0  ;;  %v592_v2 = vpop.xlane.xlu1 %591 }
 0x3aa   : > { %374 = vadd.xlane.f32.xlu1 %v373_v62  ;;  %v593_v3 = vsub.f32 %v589_v50, %v592_v2 }
 0x3ac   : > { %v594_v4 = vmul.f32 1.442695, %v593_v3 }
 0x3ae   : > { %853 = vpow2.f32 %v594_v4 }
 0x3b0   : > { %v852_v63 = vpop.eup %851 }
 0x3b1   : > { %v485_v1 = vsel %vm207_vm1, %v852_v63, 0.0 }
 0x3b2   : > { %486 = vadd.xlane.f32.xlu0 %v485_v1 }
 0x3b8   : > { %v854_v5 = vpop.eup %853 }
 0x3b9   : > { %v596_v6 = vsel %vm207_vm1, %v854_v5, 0.0 }
 0x3bb   : > { %491 = vrot.lane.b32.xlu1 %v937_v18, %s872_s22 }
 0x3c8   : > { %380 = vrot.lane.b32.xlu0 %v937_v18, %s871_s21 }
 0x3df   : > { %597 = vadd.xlane.f32.xlu1 %v596_v6 }
 0x3f0   : > { %602 = vrot.lane.b32.xlu1 %v937_v18, %s873_s23 }
 0x437   : > { %v375_v7 = vpop.xlane.xlu1 %374 }
 0x438   : > { %855 = vrcp.f32 %v375_v7 }
 0x43b   : > { %v492_v13 = vpop.permute.xlu1 %491 }
 0x43c   : > { %v497_v15 = vsel %vm270_vm2, %v492_v13, 0 }
 0x43f   : > { %v487_v8 = vpop.xlane.xlu0 %486 }
 0x440   : > { %857 = vrcp.f32 %v487_v8 }
 0x442   : > { %v856_v9 = vpop.eup %855 }
 0x443   : > { %v377_v10 = vmul.f32 %v856_v9, %v850_v61  ;;  %v381_v11 = vpop.permute.xlu0 %380 }
 0x444   : > { %v386_v12 = vsel %vm270_vm2, %v381_v11, 0 }
 0x445   : > { %800 = vmatpush3.bf16.msra.mxu0 %v386_v12  ;;  %v378_v14 = vpack.c.bf16 %v377_v10, %v377_v10 }
 0x446   : > { %811 = vmatprep.subr.bf16.mxu0 %v869_v0 }
 0x448   : > { %802 = vmatmul.mubr.msk.bf16.vlgmr.msra.gmra.mrb[4].mxu0 %vm207_vm1, %v378_v14 }
 0x449   : > { %812 = vmatpush3.bf16.msra.mxu0 %v497_v15  ;;  %813 = vmatprep.mubr.msk.bf16.mxu0 %vm870_vm0, %v869_v0 }
 0x44a   : > { %v858_v16 = vpop.eup %857  ;;  %823 = vmatprep.subr.bf16.mxu0 %v869_v0 }
 0x44b   : > { %v489_v17 = vmul.f32 %v858_v16, %v852_v63 }
 0x44d   : > { %v490_v18 = vpack.c.bf16 %v489_v17, %v489_v17 }
 0x450   : > { %814 = vmatmul.mubr.msk.bf16.vlgmr.msra.gmra.mrb[8].mxu0 %vm207_vm1, %v490_v18 }
 0x451   : > { %825 = vmatprep.mubr.msk.bf16.mxu0 %vm870_vm0, %v869_v0 }
 0x46c   : > { %v598_v19 = vpop.xlane.xlu1 %597 }
 0x46d   : > { %859 = vrcp.f32 %v598_v19 }
 0x470   : > { %v603_v20 = vpop.permute.xlu1 %602 }
 0x471   : > { %v608_v21 = vsel %vm270_vm2, %v603_v20, 0 }
 0x472   : > { %824 = vmatpush3.bf16.msra.mxu0 %v608_v21 }
 0x477   : > { %v860_v22 = vpop.eup %859 }
 0x478   : > { %v600_v23 = vmul.f32 %v860_v22, %v854_v5 }
 0x47a   : > { %v601_v24 = vpack.c.bf16 %v600_v23, %v600_v23 }
 0x47c   : > { %826 = vmatmul.mubr.msk.bf16.vlgmr.msra.gmra.mrb[12].mxu0 %vm207_vm1, %v601_v24 }
 0x51b   : > { %v422_v25 = vpop.f32.mrb[4].mxu0 }
 0x51c   : > { %651 = vrot.lane.b32.xlu0 %v422_v25, %s874_s27  ;;  %v803_v26 = vpop.f32.mrb[5].mxu0 }
 0x51d   : > { %v425_v27 = vpop.f32.mrb[6].mxu0 }
 0x51e   : > { %v804_v28 = vpop.f32.mrb[7].mxu0 }
 0x523   : > { %v533_v29 = vpop.f32.mrb[8].mxu0 }
 0x524   : > { %655 = vrot.lane.b32.xlu1 %v533_v29, %s875_s28  ;;  %v815_v0 = vpop.f32.mrb[9].mxu0 }
 0x525   : > { %v536_v30 = vpop.f32.mrb[10].mxu0 }
 0x526   : > { %v816_v31 = vpop.f32.mrb[11].mxu0 }
 0x54f   : > { %v644_v32 = vpop.f32.mrb[12].mxu0 }
 0x550   : > { %659 = vrot.lane.b32.xlu0 %v644_v32, %s876_s29  ;;  %v827_v34 = vpop.f32.mrb[13].mxu0 }
 0x551   : > { %v647_v35 = vpop.f32.mrb[14].mxu0 }
 0x552   : > { %v828_v36 = vpop.f32.mrb[15].mxu0 }
 0x58e   : > { %v652_v37 = vpop.permute.xlu0 %651 }
 0x58f   : > { %v662_v39 = vsel %vm207_vm1, %v958_v33, %v652_v37 }
 0x596   : > { %v656_v38 = vpop.permute.xlu1 %655 }
 0x597   : > { %v664_v40 = vsel %vm663_vm3, %v662_v39, %v656_v38 }
 0x5c2   : > { %v660_v41 = vpop.permute.xlu0 %659 }
 0x5c3   : > { %v666_v42 = vsel %vm665_vm4, %v664_v40, %v660_v41 }
 0x5c4   : > { %668 = vst.msk [vmem:[%s199_s5] sm:$0xff] %vm667_vm5, %v666_v42 }
 0x5c5 PF: > { %s13_s12 = sadd.s32 1, %s867_s12  }
 0x5c6   : > { %p10_p4 = scmp.ge.s32.totalorder %s13_s12, 4  }
 0x5c8   :  { %12 = sbr.rel (!%p10_p4) target bundleno = 1 (0x1), region = 68 }

// kernel: encoder_forward.14
= control target key start
LH: loop header
LB: loop body
LE: loop exit
PB: predicated region body
PF: predicated region fallthrough
CT: control target
= control target key end

     0   :  { %vm23_vm0 = vcmask 261120   ;;  %v171_v15 = vmov 0.0   ;;  %vm172_vm1 = vmmov 0   ;;  %vm139_vm2 = vcmask 523264   ;;  %s235_s0 = inlined_call_operand.vmem [shape: f32[16,32], index: 0, kind: input, shape index: {}]   ;;  %s236_s3 = inlined_call_operand.vmem [shape: bf16[32,64], index: 3, kind: input, shape index: {}]   ;;  %s237_s1 = inlined_call_operand.vmem [shape: f32[1,32], index: 1, kind: input, shape index: {}]   ;;  %s238_s2 = inlined_call_operand.vmem [shape: f32[1,32], index: 2, kind: input, shape index: {}]   ;;  %s239_s4 = inlined_call_operand.vmem [shape: f32[1,64], index: 4, kind: input, shape index: {}]   ;;  %s240_s5 = inlined_call_operand.vmem [shape: f32[16,64], index: 5, kind: output, shape index: {}]  }
   0x1   :  { %v21_v0 = vld [vmem:[%s235_s0] sm:$0xff]  ;;  %v22_v1 = vld [vmem:[%s235_s0 + $0x8] sm:$0xff]  ;;  %155 = vmatprep.subr.bf16.mxu0 %v171_v15  ;;  %159 = vmatprep.mubr.msk.bf16.mxu0 %vm172_vm1, %v171_v15 }
   0x2   :  { %v24_v2 = vsel %vm23_vm0, %v21_v0, 0.0  ;;  %v27_v3 = vsel %vm23_vm0, %v22_v1, 0.0  ;;  %v165_v14 = vld [vmem:[%s236_s3] sm:$0xff]   ;;  %v166_v16 = vld [vmem:[%s236_s3 + $0x8] sm:$0xff]  }
   0x3   :  { %25 = vadd.xlane.f32.xlu0 %v24_v2  ;;  %156 = vmatpush3.bf16.msra.mxu0 %v165_v14  ;;  %v146_v25 = vld [vmem:[%s237_s1] ss:$0 sm:$0xff] }
   0x4   :  { %157 = vmatprep.subr.bf16.mxu0 %v171_v15  ;;  %v147_v29 = vld [vmem:[%s238_s2] ss:$0 sm:$0xff] }
   0x5   :  { %v148_v34 = vld [vmem:[%s239_s4] ss:$0 sm:$0xff] }
   0x7   :  { %28 = vadd.xlane.f32.xlu0 %v27_v3  ;;  %158 = vmatpush3.bf16.msra.mxu0 %v166_v16 }
  0x90   :  { %v26_v4 = vpop.xlane.xlu0 %25 }
  0x91   :  { %v31_v5 = vmul.f32 0.03125, %v26_v4 }
  0x93   :  { %v33_v6 = vsub.f32 %v21_v0, %v31_v5 }
  0x94   :  { %v29_v7 = vpop.xlane.xlu0 %28 }
  0x95   :  { %v32_v8 = vmul.f32 0.03125, %v29_v7  ;;  %v35_v9 = vmul.f32 %v33_v6, %v33_v6 }
  0x97   :  { %v34_v10 = vsub.f32 %v22_v1, %v32_v8  ;;  %v37_v11 = vsel %vm23_vm0, %v35_v9, 0.0 }
  0x98   :  { %38 = vadd.xlane.f32.xlu1 %v37_v11 }
  0x99   :  { %v36_v12 = vmul.f32 %v34_v10, %v34_v10 }
  0x9b   :  { %v40_v13 = vsel %vm23_vm0, %v36_v12, 0.0 }
  0x9c   :  { %41 = vadd.xlane.f32.xlu1 %v40_v13 }
 0x125   :  { %v39_v17 = vpop.xlane.xlu1 %38 }
 0x126   :  { %v43_v18 = vmul.f32 0.03125, %v39_v17 }
 0x128   :  { %v45_v19 = vadd.f32 1e-05, %v43_v18 }
 0x129   :  { %v42_v20 = vpop.xlane.xlu1 %41 }
 0x12a   :  { %167 = vrsqrt.f32 %v45_v19  ;;  %v44_v21 = vmul.f32 0.03125, %v42_v20 }
 0x12c   :  { %v46_v22 = vadd.f32 1e-05, %v44_v21 }
 0x12e   :  { %169 = vrsqrt.f32 %v46_v22 }
 0x134   :  { %v168_v23 = vpop.eup %167 }
 0x135   :  { %v49_v24 = vmul.f32 %v168_v23, %v33_v6 }
 0x137   :  { %v58_v28 = vmul.f32 %v146_v25, %v49_v24 }
 0x138   :  { %v170_v26 = vpop.eup %169 }
 0x139   :  { %v50_v27 = vmul.f32 %v170_v26, %v34_v10  ;;  %v67_v31 = vadd.f32 %v147_v29, %v58_v28 }
 0x13b   :  { %v59_v30 = vmul.f32 %v146_v25, %v50_v27 }
 0x13d   :  { %v68_v32 = vadd.f32 %v147_v29, %v59_v30 }
 0x13f   :  { %v69_v33 = vpack.c.bf16 %v68_v32, %v67_v31 }
 0x141   :  { %160 = vmatmul.mubr.msk.bf16.vlgmr.msra.gmra.mrb[0].mxu0 %vm23_vm0, %v69_v33 }
 0x214   :  { %v130_v35 = vpop.f32.mrb[0].mxu0 }
 0x215   :  { %v131_v36 = vadd.f32 %v148_v34, %v130_v35  ;;  %v161_v37 = vpop.f32.mrb[1].mxu0 }
 0x216   :  { %v133_v38 = vpop.f32.mrb[2].mxu0 }
 0x217   :  { %v137_v39 = vmax.f32 %v131_v36, 0.0  ;;  %v134_v40 = vadd.f32 %v148_v34, %v133_v38  ;;  %v162_v41 = vpop.f32.mrb[3].mxu0 }
 0x219   :  { %140 = vst.msk [vmem:[%s240_s5] sm:$0xff] %vm139_vm2, %v137_v39  ;;  %v138_v42 = vmax.f32 %v134_v40, 0.0 }
 0x21b   :  { %141 = vst.msk [vmem:[%s240_s5 + $0x8] sm:$0xff] %vm139_vm2, %v138_v42 }

// kernel: encoder_forward.15
= control target key start
LH: loop header
LB: loop body
LE: loop exit
PB: predicated region body
PF: predicated region fallthrough
CT: control target
= control target key end

     0   :  { %vm22_vm0 = vcmask 261120   ;;  %v165_v0 = vmov 0.0   ;;  %vm166_vm1 = vmmov 0   ;;  %vm62_vm2 = vcmask 523264   ;;  %s231_s1 = inlined_call_operand.vmem [shape: bf16[64,32], index: 1, kind: input, shape index: {}]   ;;  %s232_s0 = inlined_call_operand.vmem [shape: f32[16,64], index: 0, kind: input, shape index: {}]   ;;  %s233_s2 = inlined_call_operand.vmem [shape: f32[1,32], index: 2, kind: input, shape index: {}]   ;;  %s234_s3 = inlined_call_operand.vmem [shape: f32[16,32], index: 3, kind: input, shape index: {}]   ;;  %s235_s4 = inlined_call_operand.vmem [shape: f32[16,32], index: 4, kind: output, shape index: {}]  }
   0x1   :  { %147 = vmatprep.subr.bf16.mxu0 %v165_v0  ;;  %v161_v1 = vld [vmem:[%s231_s1] sm:$0xff]   ;;  %155 = vmatprep.mubr.msk.bf16.mxu0 %vm166_vm1, %v165_v0  ;;  %23 = vst.msk [vmem:[#allocation2] sm:$0xff] %vm22_vm0, %v165_v0  ;;  %24 = vst.msk [vmem:[#allocation2 + $0x8] sm:$0xff] %vm22_vm0, %v165_v0  ;;  %v162_v2 = vld [vmem:[%s231_s1 + $0x8] sm:$0xff]  }
   0x2   :  { %148 = vmatpush3.bf16.msra.mxu0 %v161_v1  ;;  %v163_v3 = vld [vmem:[%s231_s1 + $0x10] sm:$0xff]   ;;  %v164_v4 = vld [vmem:[%s231_s1 + $0x18] sm:$0xff]   ;;  %v25_v5 = vld [vmem:[%s232_s0] sm:$0xff] }
   0x3   :  { %149 = vmatprep.subr.bf16.mxu0 %v165_v0  ;;  %v26_v6 = vld [vmem:[%s232_s0 + $0x8] sm:$0xff]  ;;  %v141_v16 = vld [vmem:[%s233_s2] ss:$0 sm:$0xff] }
   0x4   :  { %v27_v7 = vpack.c.bf16 %v26_v6, %v25_v5  ;;  %v126_v18 = vld [vmem:[%s234_s3] sm:$0xff]  ;;  %v127_v20 = vld [vmem:[%s234_s3 + $0x8] sm:$0xff] }
   0x6   :  { %150 = vmatpush3.bf16.msra.mxu0 %v162_v2 }
   0x7   :  { %151 = vmatprep.subr.bf16.mxu0 %v165_v0 }
   0x8   :  { %v36_v8 = vld [vmem:[#allocation2] sm:$0xff]  ;;  %v37_v10 = vld [vmem:[#allocation2 + $0x8] sm:$0xff] }
   0xa   :  { %152 = vmatpush3.bf16.msra.mxu0 %v163_v3 }
   0xb   :  { %153 = vmatprep.subr.bf16.mxu0 %v165_v0 }
   0xe   :  { %154 = vmatpush3.bf16.msra.mxu0 %v164_v4 }
  0x11   :  { %156 = vmatmul.mubr.msk.bf16.vlgmr.msra.gmra.mrb[0].mxu0 %vm62_vm2, %v27_v7 }
  0xe4   :  { %v100_v9 = vpop.f32.mrb[0].mxu0 }
  0xe5   :  { %v107_v11 = vadd.f32 %v100_v9, %v36_v8  ;;  %v157_v12 = vpop.f32.mrb[1].mxu0 }
  0xe6   :  { %v103_v13 = vpop.f32.mrb[2].mxu0 }
  0xe7   :  { %110 = vst.msk [vmem:[#allocation2] sm:$0xff] %vm22_vm0, %v107_v11  ;;  %v108_v14 = vadd.f32 %v103_v13, %v37_v10  ;;  %v158_v15 = vpop.f32.mrb[3].mxu0 }
  0xe9   :  { %111 = vst.msk [vmem:[#allocation2 + $0x8] sm:$0xff] %vm22_vm0, %v108_v14 }
  0xee   :  { %v115_v17 = vld [vmem:[#allocation2] sm:$0xff] }
  0xef   :  { %v124_v19 = vadd.f32 %v141_v16, %v115_v17 }
  0xf0   :  { %v116_v21 = vld [vmem:[#allocation2 + $0x8] sm:$0xff] }
  0xf1   :  { %v128_v22 = vadd.f32 %v126_v18, %v124_v19  ;;  %v125_v23 = vadd.f32 %v141_v16, %v116_v21 }
  0xf3   :  { %130 = vst.msk [vmem:[%s235_s4] sm:$0xff] %vm22_vm0, %v128_v22  ;;  %v129_v24 = vadd.f32 %v127_v20, %v125_v23 }
  0xf5   :  { %131 = vst.msk [vmem:[%s235_s4 + $0x8] sm:$0xff] %vm22_vm0, %v129_v24 }

// kernel: encoder_forward.21
= control target key start
LH: loop header
LB: loop body
LE: loop exit
PB: predicated region body
PF: predicated region fallthrough
CT: control target
= control target key end

     0   :  { %vm16_vm0 = vcmask 261120   ;;  %s118_s0 = inlined_call_operand.vmem [shape: f32[16,32], index: 0, kind: input, shape index: {}]   ;;  %s119_s1 = inlined_call_operand.vmem [shape: f32[1,32], index: 1, kind: input, shape index: {}]   ;;  %s120_s2 = inlined_call_operand.vmem [shape: f32[1,32], index: 2, kind: input, shape index: {}]   ;;  %s121_s3 = inlined_call_operand.vmem [shape: f32[16,32], index: 3, kind: output, shape index: {}]  }
   0x1   :  { %v14_v0 = vld [vmem:[%s118_s0] sm:$0xff]  ;;  %v15_v1 = vld [vmem:[%s118_s0 + $0x8] sm:$0xff] }
   0x2   :  { %v17_v2 = vsel %vm16_vm0, %v14_v0, 0.0  ;;  %v20_v3 = vsel %vm16_vm0, %v15_v1, 0.0  ;;  %v68_v21 = vld [vmem:[%s119_s1] ss:$0 sm:$0xff] }
   0x3   :  { %18 = vadd.xlane.f32.xlu0 %v17_v2  ;;  %v69_v23 = vld [vmem:[%s120_s2] ss:$0 sm:$0xff] }
   0x7   :  { %21 = vadd.xlane.f32.xlu0 %v20_v3 }
  0x90   :  { %v19_v4 = vpop.xlane.xlu0 %18 }
  0x91   :  { %v24_v5 = vmul.f32 0.03125, %v19_v4 }
  0x93   :  { %v26_v6 = vsub.f32 %v14_v0, %v24_v5 }
  0x94   :  { %v22_v7 = vpop.xlane.xlu0 %21 }
  0x95   :  { %v25_v8 = vmul.f32 0.03125, %v22_v7  ;;  %v28_v9 = vmul.f32 %v26_v6, %v26_v6 }
  0x97   :  { %v27_v10 = vsub.f32 %v15_v1, %v25_v8  ;;  %v30_v11 = vsel %vm16_vm0, %v28_v9, 0.0 }
  0x98   :  { %31 = vadd.xlane.f32.xlu1 %v30_v11 }
  0x99   :  { %v29_v12 = vmul.f32 %v27_v10, %v27_v10 }
  0x9b   :  { %v33_v13 = vsel %vm16_vm0, %v29_v12, 0.0 }
  0x9c   :  { %34 = vadd.xlane.f32.xlu1 %v33_v13 }
 0x125   :  { %v32_v14 = vpop.xlane.xlu1 %31 }
 0x126   :  { %v36_v15 = vmul.f32 0.03125, %v32_v14 }
 0x128   :  { %v38_v16 = vadd.f32 1e-05, %v36_v15 }
 0x129   :  { %v35_v17 = vpop.xlane.xlu1 %34 }
 0x12a   :  { %70 = vrsqrt.f32 %v38_v16  ;;  %v37_v18 = vmul.f32 0.03125, %v35_v17 }
 0x12c   :  { %v39_v19 = vadd.f32 1e-05, %v37_v18 }
 0x12e   :  { %72 = vrsqrt.f32 %v39_v19 }
 0x134   :  { %v71_v20 = vpop.eup %70 }
 0x135   :  { %v42_v22 = vmul.f32 %v71_v20, %v26_v6 }
 0x137   :  { %v51_v24 = vmul.f32 %v68_v21, %v42_v22 }
 0x138   :  { %v73_v25 = vpop.eup %72 }
 0x139   :  { %v60_v26 = vadd.f32 %v69_v23, %v51_v24  ;;  %v43_v27 = vmul.f32 %v73_v25, %v27_v10 }
 0x13b   :  { %62 = vst.msk [vmem:[%s121_s3] sm:$0xff] %vm16_vm0, %v60_v26  ;;  %v52_v28 = vmul.f32 %v68_v21, %v43_v27 }
 0x13d   :  { %v61_v29 = vadd.f32 %v69_v23, %v52_v28 }
 0x13f   :  { %63 = vst.msk [vmem:[%s121_s3 + $0x8] sm:$0xff] %vm16_vm0, %v61_v29 }

</bundles_post_ra>
